<compile_context>
chip_gen: v5e
topology: v5e:2x2
jax: 0.10.0
libtpu: 0.0.40
codegen_flags: <defaults>
</compile_context>

<pallas_src>
import functools
import math

import numpy as np

import jax
import jax.numpy as jnp
from jax.experimental import pallas as pl
from jax.experimental.pallas import tpu as pltpu


def _round_up(x: int, m: int) -> int:
    return (x + m - 1) // m * m


# ---------------------------------------------------------------------------
# Parameter construction (matches torch.hann_window / torchaudio 0.8 create_fb_matrix)
# ---------------------------------------------------------------------------
def hann_window(win_length: int) -> jnp.ndarray:
    # torch.hann_window(win_length) is periodic: 0.5 * (1 - cos(2*pi*n / N))
    n = jnp.arange(win_length, dtype=jnp.float32)
    return (0.5 - 0.5 * jnp.cos(2.0 * math.pi * n / win_length)).astype(jnp.float32)


def create_fb_matrix(n_freqs, f_min, f_max, n_mels, sample_rate, norm=None):
    all_freqs = jnp.linspace(0.0, float(sample_rate // 2), n_freqs)
    m_min = 2595.0 * math.log10(1.0 + f_min / 700.0)
    m_max = 2595.0 * math.log10(1.0 + f_max / 700.0)
    m_pts = jnp.linspace(m_min, m_max, n_mels + 2)
    f_pts = 700.0 * (10.0 ** (m_pts / 2595.0) - 1.0)
    f_diff = f_pts[1:] - f_pts[:-1]                      # (n_mels + 1,)
    slopes = f_pts[None, :] - all_freqs[:, None]         # (n_freqs, n_mels + 2)
    down_slopes = (-1.0 * slopes[:, :-2]) / f_diff[:-1]
    up_slopes = slopes[:, 2:] / f_diff[1:]
    fb = jnp.maximum(0.0, jnp.minimum(down_slopes, up_slopes))
    if norm == "slaney":
        enorm = 2.0 / (f_pts[2:n_mels + 2] - f_pts[:n_mels])
        fb = fb * enorm[None, :]
    return fb.astype(jnp.float32)                        # (n_freqs, n_mels)


# ---------------------------------------------------------------------------
# Pallas kernel: fused windowed-DFT matmul + complex square + mel projection
# via linearity (two small matmuls, no concatenate).  Inputs arrive transposed
# so the kernel output is lane-dense (n_mels, frame_tile):
#   frames_ref : (1, n_fft, tile)        bf16   (frames on lanes)
#   dft_ref    : (2*n_freq_pad, n_fft)   bf16   (rows 0..n_freq_pad-1 real, rest imag)
#   fb_ref     : (n_mels, n_freq_pad)    bf16
# ---------------------------------------------------------------------------
def _cplx_mel_kernel(frames_ref, dft_ref, fb_ref, out_re_ref, out_im_ref, *,
                     apply_square):
    x = frames_ref[0]                                    # (n_fft, tile) bf16

    # Fused real+imag windowed DFT: one MXU pass over the frames tile (K masked to 400).
    spec = jnp.dot(dft_ref[...], x, preferred_element_type=jnp.float32)
    n_freq_pad = spec.shape[0] // 2
    re = spec[:n_freq_pad]                               # (n_freq_pad, tile) f32
    im = spec[n_freq_pad:]

    if apply_square:
        # spec.pow(2.0) on complex values: (re + i*im)^2 -- done in f32 on the VPU.
        re2 = re * re - im * im
        im2 = 2.0 * (re * im)
    else:
        re2, im2 = re, im                                # power=None / power=1.0

    # Complex mel projection with fb = fb + i*fb, via linearity (no concat needed):
    #   Re(out) = fb @ re2 - fb @ im2 ,  Im(out) = fb @ re2 + fb @ im2
    # TODO(synk): on v6e/v7x a 256-row packed FB2=[[fb,-fb],[fb,fb]] matmul could fill
    # the full MXU and fold the add/sub away; keep the portable form until profiled.
    mel_a = jnp.dot(fb_ref[...], re2.astype(jnp.bfloat16),
                    preferred_element_type=jnp.float32)
    mel_b = jnp.dot(fb_ref[...], im2.astype(jnp.bfloat16),
                    preferred_element_type=jnp.float32)
    out_re_ref[0] = mel_a - mel_b
    out_im_ref[0] = mel_a + mel_b


def _choose_tile_frames(n_frames: int, batch: int) -> int:
    """Largest lane tile (multiple of 128) with <=10% frame-padding waste and at
    least 2 total grid steps (keeps both v7x TensorCores busy via 'parallel')."""
    n128 = _round_up(n_frames, 128)
    for cand in (2048, 1024, 512, 256):
        if cand > n128:
            continue
        padded = _round_up(n_frames, cand)
        waste = (padded - n_frames) / padded
        if waste <= 0.10 and batch * (padded // cand) >= 2:
            return cand
    return 128  # minimum legal lane tile; B=1 short clips can't be split further


def cplx_mel_spectrogram(waveform, *, sample_rate=16000, n_fft=400, win_length=None,
                         hop_length=None, f_min=0.0, f_max=None, pad=0, n_mels=128,
                         power=2.0, normalized=False, center=True, pad_mode="reflect",
                         onesided=True, norm=None):
    assert power is None or power in (1.0, 2.0), "only power in {None, 1.0, 2.0}"
    # TODO(synk): arbitrary fractional `power` (complex spec_f.pow(p)) not implemented.
    assert center and pad_mode == "reflect" and onesided

    win_length = win_length if win_length is not None else n_fft
    hop_length = hop_length if hop_length is not None else win_length // 2
    f_max = f_max if f_max is not None else float(sample_rate // 2)

    waveform = waveform.astype(jnp.float32)
    if pad > 0:
        waveform = jnp.pad(waveform, [(0, 0)] * (waveform.ndim - 1) + [(pad, pad)])

    lead_shape = waveform.shape[:-1]
    T = waveform.shape[-1]
    wav2d = waveform.reshape(-1, T)                      # (B, T)
    B = wav2d.shape[0]

    # center=True reflect padding (matches torch.stft)
    half = n_fft // 2
    padded = jnp.pad(wav2d, ((0, 0), (half, half)), mode="reflect")
    n_frames = 1 + (padded.shape[-1] - n_fft) // hop_length

    n_freq = n_fft // 2 + 1
    n_freq_pad = _round_up(n_freq, 128)
    tile_frames = _choose_tile_frames(n_frames, B)
    n_frames_pad = _round_up(n_frames, tile_frames)

    # --- Single-pass bf16 framing: cast once, append one zero slot, one gather
    # produces the final (B, n_fft, n_frames_pad) bf16 frames with padding frames
    # already zero.  No separate jnp.pad / astype passes over the big array, and the
    # n_fft axis is not padded through HBM (the kernel BlockSpec uses the full dim).
    # TODO(synk): when n_fft % hop_length == 0 the gather could be dropped entirely via
    # a hop-block matmul decomposition (two offset in_specs on a reshaped waveform).
    padded_bf16 = jnp.concatenate(
        [padded.astype(jnp.bfloat16), jnp.zeros((B, 1), jnp.bfloat16)], axis=-1)
    zero_idx = padded.shape[-1]                          # index of the appended zero
    fi = jnp.arange(n_fft, dtype=jnp.int32)[:, None]
    ti = jnp.arange(n_frames_pad, dtype=jnp.int32)[None, :]
    idx = jnp.where(ti < n_frames, fi + ti * hop_length, zero_idx)
    frames_t = padded_bf16[:, idx]                       # (B, n_fft, n_frames_pad) bf16

    # Window (zero-padded/centered to n_fft if win_length < n_fft, as torch.stft does).
    window = hann_window(win_length)
    if win_length < n_fft:
        left = (n_fft - win_length) // 2
        window = jnp.pad(window, (left, n_fft - win_length - left))

    # Fused onesided DFT matrix with the window (and normalization) folded in:
    # shape (2*n_freq_pad, n_fft), real rows on top, imag rows below.
    n = jnp.arange(n_fft, dtype=jnp.float32)[None, :]
    k = jnp.arange(n_freq, dtype=jnp.float32)[:, None]
    ang = 2.0 * math.pi * n * k / n_fft
    dft_re = window[None, :] * jnp.cos(ang)              # (n_freq, n_fft)
    dft_im = -window[None, :] * jnp.sin(ang)
    if normalized:
        scale = 1.0 / jnp.sqrt(jnp.sum(window ** 2))
        dft_re = dft_re * scale
        dft_im = dft_im * scale
    dft_re = jnp.pad(dft_re, ((0, n_freq_pad - n_freq), (0, 0)))
    dft_im = jnp.pad(dft_im, ((0, n_freq_pad - n_freq), (0, 0)))
    dft = jnp.concatenate([dft_re, dft_im], axis=0).astype(jnp.bfloat16)

    fb = create_fb_matrix(n_freq, f_min, f_max, n_mels, sample_rate, norm)
    fb_t = jnp.pad(fb.T, ((0, 0), (0, n_freq_pad - n_freq))).astype(jnp.bfloat16)

    grid = (B, n_frames_pad // tile_frames)

    # Advisory cost estimate + explicit VMEM budget (capped at 48 MiB for v7x's 64 MiB).
    flops = (2 * (2 * n_freq_pad) * n_fft * n_frames_pad * B
             + 2 * 2 * n_mels * n_freq_pad * n_frames_pad * B)
    bytes_accessed = (frames_t.size * 2 + dft.size * 2 + fb_t.size * 2
                      + 2 * B * n_mels * n_frames_pad * 4)
    bytes_per_step = (
        2 * (n_fft * tile_frames * 2)                    # frames (bf16, double-buffered)
        + 2 * (2 * n_freq_pad * n_fft * 2)               # dft (constant block)
        + 2 * (n_mels * n_freq_pad * 2)                  # fb (constant block)
        + 2 * 2 * (n_mels * tile_frames * 4)             # two f32 outputs
        + 10 * (n_freq_pad * tile_frames * 4))           # f32/bf16 intermediates
    vmem_limit = int(min(48 * 1024 * 1024,
                         max(24 * 1024 * 1024, 2 * bytes_per_step)))

    kernel = functools.partial(_cplx_mel_kernel, apply_square=(power == 2.0))
    out_shape = (jax.ShapeDtypeStruct((B, n_mels, n_frames_pad), jnp.float32),
                 jax.ShapeDtypeStruct((B, n_mels, n_frames_pad), jnp.float32))

    mel_re, mel_im = pl.pallas_call(
        kernel,
        out_shape=out_shape,
        grid_spec=pltpu.PrefetchScalarGridSpec(
            num_scalar_prefetch=0,
            grid=grid,
            in_specs=[
                pl.BlockSpec((1, n_fft, tile_frames), lambda b, t: (b, 0, t)),
                pl.BlockSpec((2 * n_freq_pad, n_fft), lambda b, t: (0, 0)),
                pl.BlockSpec((n_mels, n_freq_pad), lambda b, t: (0, 0)),
            ],
            out_specs=[
                pl.BlockSpec((1, n_mels, tile_frames), lambda b, t: (b, 0, t)),
                pl.BlockSpec((1, n_mels, tile_frames), lambda b, t: (b, 0, t)),
            ],
        ),
        compiler_params=pltpu.CompilerParams(
            dimension_semantics=("parallel", "parallel"),
            vmem_limit_bytes=vmem_limit),
        cost_estimate=pl.CostEstimate(
            flops=flops, transcendentals=0, bytes_accessed=bytes_accessed),
    )(frames_t, dft, fb_t)

    # Drop frame padding and assemble complex64 (matches the torch module's output).
    # TODO(synk): bandwidth-sensitive consumers can take (mel_re, mel_im) directly and
    # skip this extra read+write over both output arrays.
    if n_frames_pad != n_frames:
        mel_re = mel_re[:, :, :n_frames]
        mel_im = mel_im[:, :, :n_frames]
    mel = jax.lax.complex(mel_re, mel_im)
    return mel.reshape(lead_shape + (n_mels, n_frames))


# ---------------------------------------------------------------------------
# High-precision NumPy/FFT reference for correctness checking.
# ---------------------------------------------------------------------------
def _reference(waveform, *, sample_rate, n_fft, hop_length, win_length, n_mels,
               f_min, f_max, norm=None):
    wav = np.asarray(waveform, dtype=np.float64)
    half = n_fft // 2
    padded = np.pad(wav, ((0, 0), (half, half)), mode="reflect")
    n_frames = 1 + (padded.shape[-1] - n_fft) // hop_length
    idx = np.arange(n_frames)[:, None] * hop_length + np.arange(n_fft)[None, :]
    nw = np.arange(win_length, dtype=np.float64)
    window = 0.5 - 0.5 * np.cos(2.0 * np.pi * nw / win_length)
    if win_length < n_fft:
        left = (n_fft - win_length) // 2
        window = np.pad(window, (left, n_fft - win_length - left))
    frames = padded[:, idx] * window[None, None, :]
    spec = np.fft.rfft(frames, n=n_fft, axis=-1)         # (B, n_frames, n_freq)
    spec2 = spec * spec                                  # power = 2.0 (complex square)
    fb = np.asarray(create_fb_matrix(n_fft // 2 + 1, f_min, f_max, n_mels,
                                     sample_rate, norm), dtype=np.float64)
    fbc = fb + 1j * fb
    mel = np.einsum("btf,fm->btm", spec2, fbc)
    return np.swapaxes(mel, 1, 2)                        # (B, n_mels, n_frames)


if __name__ == "__main__":
    # Module defaults (sample_rate=16000, n_fft=400, hop=200, n_mels=128), short clip.
    sample_rate = 16000
    n_fft = 400
    win_length = 400
    hop_length = 200
    n_mels = 128

    key = jax.random.PRNGKey(0)
    waveform = jax.random.normal(key, (2, 4000), dtype=jnp.float32)  # (batch, time)

    out = cplx_mel_spectrogram(
        waveform,
        sample_rate=sample_rate,
        n_fft=n_fft,
        win_length=win_length,
        hop_length=hop_length,
        n_mels=n_mels,
    )
    out = jax.block_until_ready(out)

    ref = _reference(np.asarray(waveform), sample_rate=sample_rate, n_fft=n_fft,
                     hop_length=hop_length, win_length=win_length, n_mels=n_mels,
                     f_min=0.0, f_max=float(sample_rate // 2))

    n_frames = 1 + 4000 // hop_length
    assert out.shape == (2, n_mels, n_frames), out.shape
    assert out.dtype == jnp.complex64

    out_np = np.asarray(out)
    scale = max(np.max(np.abs(ref.real)), np.max(np.abs(ref.imag)))
    err_re = np.max(np.abs(out_np.real - ref.real)) / scale
    err_im = np.max(np.abs(out_np.imag - ref.imag)) / scale
    # bf16 MXU operands with f32 accumulation: expected max-normalized error ~1%.
    assert err_re < 5e-2 and err_im < 5e-2, (err_re, err_im)
    print("KERNEL_OK")
</pallas_src>

<mosaic_0001>
module attributes {stable_mosaic.version = 11 : i64} {
  func.func @_cplx_mel_kernel(%arg0: i32, %arg1: i32, %arg2: memref<1x400x128xbf16, #tpu.memory_space<vmem>>, %arg3: memref<512x400xbf16, #tpu.memory_space<vmem>>, %arg4: memref<128x256xbf16, #tpu.memory_space<vmem>>, %arg5: memref<1x128x128xf32, #tpu.memory_space<vmem>>, %arg6: memref<1x128x128xf32, #tpu.memory_space<vmem>>) attributes {dimension_semantics = [#tpu.dimension_semantics<parallel>, #tpu.dimension_semantics<parallel>], iteration_bounds = array<i64: 2, 1>, scalar_prefetch = 0 : i64, scratch_operands = 0 : i64, tpu.core_type = #tpu.core_type<tc>, window_params = [{transform_indices = @transform_0, window_bounds = array<i64: 1, 400, 128>}, {pipeline_mode = #tpu.pipeline_mode<synchronous>, transform_indices = @transform_1, window_bounds = array<i64: 512, 400>}, {pipeline_mode = #tpu.pipeline_mode<synchronous>, transform_indices = @transform_2, window_bounds = array<i64: 128, 256>}, {transform_indices = @transform_3, window_bounds = array<i64: 1, 128, 128>}, {transform_indices = @transform_4, window_bounds = array<i64: 1, 128, 128>}]} {
    %c0 = arith.constant 0 : index
    %c0_0 = arith.constant 0 : index
    %c0_1 = arith.constant 0 : index
    %0 = vector.load %arg2[%c0, %c0_0, %c0_1] : memref<1x400x128xbf16, #tpu.memory_space<vmem>>, vector<1x400x128xbf16>
    %1 = vector.shape_cast %0 : vector<1x400x128xbf16> to vector<400x128xbf16>
    %c0_2 = arith.constant 0 : index
    %c0_3 = arith.constant 0 : index
    %2 = vector.load %arg3[%c0_2, %c0_3] : memref<512x400xbf16, #tpu.memory_space<vmem>>, vector<512x400xbf16>
    %cst = arith.constant dense<0.000000e+00> : vector<512x128xf32>
    %3 = tpu.matmul %2, %1, %cst {dimension_numbers = #tpu.dot_dimension_numbers<[1], [0], [0], [1], [0, 0, 1, 1], [], []>} : vector<512x400xbf16>, vector<400x128xbf16>, vector<512x128xf32> -> vector<512x128xf32>
    %4 = vector.extract_strided_slice %3 {offsets = [0, 0], sizes = [256, 128], strides = [1, 1]} : vector<512x128xf32> to vector<256x128xf32>
    %5 = vector.extract_strided_slice %3 {offsets = [256, 0], sizes = [256, 128], strides = [1, 1]} : vector<512x128xf32> to vector<256x128xf32>
    %6 = arith.mulf %4, %4 : vector<256x128xf32>
    %7 = arith.mulf %5, %5 : vector<256x128xf32>
    %8 = arith.subf %6, %7 : vector<256x128xf32>
    %9 = arith.mulf %4, %5 : vector<256x128xf32>
    %cst_4 = arith.constant 2.000000e+00 : f32
    %10 = vector.broadcast %cst_4 : f32 to vector<256x128xf32>
    %11 = arith.mulf %10, %9 : vector<256x128xf32>
    %c0_5 = arith.constant 0 : index
    %c0_6 = arith.constant 0 : index
    %12 = vector.load %arg4[%c0_5, %c0_6] : memref<128x256xbf16, #tpu.memory_space<vmem>>, vector<128x256xbf16>
    %13 = arith.truncf %8 : vector<256x128xf32> to vector<256x128xbf16>
    %cst_7 = arith.constant dense<0.000000e+00> : vector<128x128xf32>
    %14 = tpu.matmul %12, %13, %cst_7 {dimension_numbers = #tpu.dot_dimension_numbers<[1], [0], [0], [1], [0, 0, 1, 1], [], []>} : vector<128x256xbf16>, vector<256x128xbf16>, vector<128x128xf32> -> vector<128x128xf32>
    %c0_8 = arith.constant 0 : index
    %c0_9 = arith.constant 0 : index
    %15 = vector.load %arg4[%c0_8, %c0_9] : memref<128x256xbf16, #tpu.memory_space<vmem>>, vector<128x256xbf16>
    %16 = arith.truncf %11 : vector<256x128xf32> to vector<256x128xbf16>
    %cst_10 = arith.constant dense<0.000000e+00> : vector<128x128xf32>
    %17 = tpu.matmul %15, %16, %cst_10 {dimension_numbers = #tpu.dot_dimension_numbers<[1], [0], [0], [1], [0, 0, 1, 1], [], []>} : vector<128x256xbf16>, vector<256x128xbf16>, vector<128x128xf32> -> vector<128x128xf32>
    %18 = arith.subf %14, %17 : vector<128x128xf32>
    %c0_11 = arith.constant 0 : index
    %c0_12 = arith.constant 0 : index
    %c0_13 = arith.constant 0 : index
    %19 = vector.load %arg5[%c0_11, %c0_12, %c0_13] : memref<1x128x128xf32, #tpu.memory_space<vmem>>, vector<1x128x128xf32>
    %20 = vector.shape_cast %19 : vector<1x128x128xf32> to vector<128x128xf32>
    %21 = vector.shape_cast %18 : vector<128x128xf32> to vector<1x128x128xf32>
    tpu.vector_store %arg5[%c0_11, %c0_12, %c0_13], %21 {strides = array<i32>} : memref<1x128x128xf32, #tpu.memory_space<vmem>>, vector<1x128x128xf32>,
    %22 = arith.addf %14, %17 : vector<128x128xf32>
    %c0_14 = arith.constant 0 : index
    %c0_15 = arith.constant 0 : index
    %c0_16 = arith.constant 0 : index
    %23 = vector.load %arg6[%c0_14, %c0_15, %c0_16] : memref<1x128x128xf32, #tpu.memory_space<vmem>>, vector<1x128x128xf32>
    %24 = vector.shape_cast %23 : vector<1x128x128xf32> to vector<128x128xf32>
    %25 = vector.shape_cast %22 : vector<128x128xf32> to vector<1x128x128xf32>
    tpu.vector_store %arg6[%c0_14, %c0_15, %c0_16], %25 {strides = array<i32>} : memref<1x128x128xf32, #tpu.memory_space<vmem>>, vector<1x128x128xf32>,
    return
  }
  func.func @transform_0(%arg0: i32, %arg1: i32) -> (i32, i32, i32) {
    %c0_i32 = arith.constant 0 : i32
    %c0_i32_0 = arith.constant 0 : i32
    return %arg0, %c0_i32, %arg1 : i32, i32, i32
  }
  func.func @transform_1(%arg0: i32, %arg1: i32) -> (i32, i32) {
    %c0_i32 = arith.constant 0 : i32
    %c0_i32_0 = arith.constant 0 : i32
    %c0_i32_1 = arith.constant 0 : i32
    return %c0_i32, %c0_i32_0 : i32, i32
  }
  func.func @transform_2(%arg0: i32, %arg1: i32) -> (i32, i32) {
    %c0_i32 = arith.constant 0 : i32
    %c0_i32_0 = arith.constant 0 : i32
    %c0_i32_1 = arith.constant 0 : i32
    return %c0_i32, %c0_i32_0 : i32, i32
  }
  func.func @transform_3(%arg0: i32, %arg1: i32) -> (i32, i32, i32) {
    %c0_i32 = arith.constant 0 : i32
    %c0_i32_0 = arith.constant 0 : i32
    return %arg0, %c0_i32, %arg1 : i32, i32, i32
  }
  func.func @transform_4(%arg0: i32, %arg1: i32) -> (i32, i32, i32) {
    %c0_i32 = arith.constant 0 : i32
    %c0_i32_0 = arith.constant 0 : i32
    return %arg0, %c0_i32, %arg1 : i32, i32, i32
  }
}

</mosaic_0001>

<bundles_post_ra>
// kernel: tpu_custom_call.1
= control target key start
LH: loop header
LB: loop body
LE: loop exit
PB: predicated region body
PF: predicated region fallthrough
CT: control target
= control target key end

     0   :  { %10 = vsyncpa [#allocation3], 0  ;;  %s5150_s0 = inlined_call_operand.vmem [shape: bf16[2,400,128], index: 0, kind: input, shape index: {}]   ;;  %s5151_s1 = inlined_call_operand.vmem [shape: bf16[512,400], index: 1, kind: input, shape index: {}]   ;;  %s5152_s2 = inlined_call_operand.vmem [shape: bf16[128,256], index: 2, kind: input, shape index: {}]   ;;  %s5153_s3 = inlined_call_operand.hbm [shape: f32[2,128,128], index: 3, kind: output, shape index: {0}]   ;;  %s5154_s4 = inlined_call_operand.hbm [shape: f32[2,128,128], index: 4, kind: output, shape index: {1}]  }
   0x1   :  { %12 = vsyncpa [#allocation3 + $0x1], 0 }
   0x2   :  { %13 = vsyncpa [#allocation5], 0 }
   0x3   :  { %15 = vsyncpa [#allocation5 + $0x1], 0  ;;  %s3742_s15 = smov 0   ;;  %s3744_s16 = smov 0  }
   0x4   :  { %s3746_s17 = smov 0   ;;  %s3748_s18 = smov 0  }
   0x5   :  { %s3750_s19 = smov 0   ;;  %s3752_s20 = smov 0  }
   0x6 LB: > { %s2645_s21 = sadd.s32 4294967295, %s3713_s20   ;;  %s2646_s22 = sadd.s32 4294967294, %s3713_s20   ;;  %s3713_s20 = sphi %s3752_s20, %s21_s20   ;;  %s3709_s19 = sphi %s3750_s19, %s5179_s19   ;;  %s3705_s18 = sphi %s3748_s18, %s5178_s18   ;;  %s3701_s17 = sphi %s3746_s17, %s5177_s17   ;;  %s3697_s16 = sphi %s3744_s16, %s5176_s16   ;;  %s3693_s15 = sphi %s3742_s15, %s5175_s15  }
   0x7   : > { %s33_s23 = sadd.s32 1, %s3709_s19  ;;  %s112_s24 = sadd.s32 1, %s3701_s17 }
   0x8   : > { %p35_p0 = scmp.ge.s32.totalorder %s33_s23, 2  ;;  %p122_p1 = scmp.ne.s32.totalorder %s3701_s17, %s3697_s16 }
   0x9   : > { %p123_p2 = scmp.eq.s32.totalorder %s2645_s21, 1  ;;  %p128_p3 = scmp.ne.s32.totalorder %s3697_s16, %s3693_s15 }
   0xa   : > { %s5181_s23 = smov (%p35_p0, %s33_s23), 0  ;;  %p129_p5 = scmp.eq.s32.totalorder %s2646_s22, 1 }
   0xb   : > { %p3782_p4 = por %p123_p2, %p122_p1  ;;  %s107_s26 = ssub.s32 %s3709_s19, %s5181_s23 }
   0xc   : > { %p2649_p6 = scmp.ge.s32.totalorder %s3713_s20, 1  ;;  %p110_p7 = scmp.eq.s32.totalorder %s107_s26, 0 }
   0xd   : > { %p3789_p8 = por %p129_p5, %p128_p3  ;;  %p192_p9 = scmp.lt.s32.totalorder %s3713_s20, 3 }
   0xe   : > { %s3795_s28 = scalar_select %p110_p7, %s3701_s17, %s112_s24  }
   0xf   : > { %p193_p10 = pnand %p2649_p6, %p192_p9 }
  0x11   : > { %196 = sbr.rel (%p193_p10) target bundleno = 1013 (0x3f5), region = 32 }
  0x16   : > { %p226_p11 = scmp.lt.s32.totalorder %s3705_s18, 1  ;;  %v3395_v6 = vld [vmem:[%s5151_s1 + $0xc] sm:$0xf]  ;;  %v2665_v7 = vld [vmem:[%s5151_s1 + $0x18] sm:$0xf0]  ;;  %vm1171_vm0 = vcmask 130048  }
  0x17   : > { %v2668_v12 = vor.u32 %v3395_v6, %v2665_v7  ;;  %v3399_v22 = vld [vmem:[%s5151_s1 + $0x2c] sm:$0xf]  ;;  %v2681_v23 = vld [vmem:[%s5151_s1 + $0x38] sm:$0xf0]  ;;  %v2655_v28 = vld [vmem:[%s5151_s1] sm:$0xf] }
  0x18   : > { %s227_s29 = scalar_select %p226_p11, %s3705_s18, 1  ;;  %v2684_v27 = vor.u32 %v3399_v22, %v2681_v23  ;;  %v3396_v29 = vld [vmem:[%s5151_s1 + $0xc] sm:$0xf0]  ;;  %v3394_v30 = vld [vmem:[%s5151_s1 + $0x4] sm:$0xf] }
  0x19   : > { %v2657_v33 = vld [vmem:[%s5151_s1 + $0x10] sm:$0xf0]  ;;  %v2663_v35 = vld [vmem:[%s5151_s1 + $0x8] sm:$0xf]  ;;  %v3397_v36 = vld [vmem:[%s5151_s1 + $0x14] sm:$0xf0]  ;;  %v2656_v37 = vor.u32 %v3396_v29, %v2655_v28 }
  0x1a   : > { %s3540_s30 = smul.u32 200, %s227_s29  ;;  %v2660_v38 = vor.u32 %v3394_v30, %v2657_v33  ;;  %v2664_v39 = vor.u32 %v3397_v36, %v2663_v35  ;;  %v3403_v40 = vld [vmem:[%s5151_s1 + $0x4c] sm:$0xf]  ;;  %v2697_v41 = vld [vmem:[%s5151_s1 + $0x58] sm:$0xf0]  ;;  %s5051_s9 = sand.u32 1, %s3697_s16  }
  0x1b   : > { %v2700_v42 = vor.u32 %v3403_v40, %v2697_v41  ;;  %v2671_v43 = vld [vmem:[%s5151_s1 + $0x20] sm:$0xf]  ;;  %v3400_v44 = vld [vmem:[%s5151_s1 + $0x2c] sm:$0xf0]  ;;  %v3398_v45 = vld [vmem:[%s5151_s1 + $0x24] sm:$0xf] }
  0x1c   : > { %s3802_s7 = scalar_lea.vmem %s5150_s0, %s3540_s30  ;;  %v2673_v46 = vld [vmem:[%s5151_s1 + $0x30] sm:$0xf0]  ;;  %v2679_v47 = vld [vmem:[%s5151_s1 + $0x28] sm:$0xf]  ;;  %v3401_v48 = vld [vmem:[%s5151_s1 + $0x34] sm:$0xf0]  ;;  %v2672_v49 = vor.u32 %v3400_v44, %v2671_v43 }
  0x1d   : > { %v3376_v0 = vld [vmem:[%s3802_s7 + $0x38] sm:$0xff]  ;;  %v3375_v3 = vld [vmem:[%s3802_s7 + $0x30] sm:$0xff]  ;;  %v3374_v8 = vld [vmem:[%s3802_s7 + $0x28] sm:$0xff]  ;;  %v2676_v50 = vor.u32 %v3398_v45, %v2673_v46  ;;  %v2680_v51 = vor.u32 %v3401_v48, %v2679_v47  ;;  %s2650_s10 = sshll.u32 %s5051_s9, 7  ;;  %s2493_s6 = scalar_lea.sflag [#allocation3], %s5051_s9 }
  0x1e   : > { %v3384_v1 = vld [vmem:[%s3802_s7 + $0x78] sm:$0xff]  ;;  %1268 = vmatpush.bf16.msra.mxu0 %v3376_v0  ;;  %v3383_v4 = vld [vmem:[%s3802_s7 + $0x70] sm:$0xff]  ;;  %v3382_v9 = vld [vmem:[%s3802_s7 + $0x68] sm:$0xff]  ;;  %s5054_s11 = scalar_lea.vmem [#allocation2], %s2650_s10  ;;  %s5057_s12 = scalar_lea.vmem [#allocation4], %s2650_s10 }
  0x1f   : > { %v3392_v2 = vld [vmem:[%s3802_s7 + $0xb8] sm:$0xff]  ;;  %1437 = vmatpush.bf16.msra.mxu1 %v3384_v1  ;;  %v3391_v5 = vld [vmem:[%s3802_s7 + $0xb0] sm:$0xff]  ;;  %v3393_v10 = vld [vmem:[%s3802_s7 + $0xc0] sm:$0xff]  ;;  %s2529_s30 = sshll.u32 %s5057_s12, 4  ;;  %s3623_s14 = scalar_lea.hbm %s5153_s3, 256  ;;  %s5098_s30 = int_to_ptr.vmem [resolvable:$true] %s2529_s30 }
  0x20   : > { %1606 = vmatpush.bf16.msra.mxu2 %v3392_v2  ;;  %v3390_v11 = vld [vmem:[%s3802_s7 + $0xa8] sm:$0xff]  ;;  %1782 = vmatpush.bf16.msra.mxu3 %v3393_v10  ;;  %v3373_v13 = vld [vmem:[%s3802_s7 + $0x20] sm:$0xff]  ;;  %v3372_v16 = vld [vmem:[%s3802_s7 + $0x18] sm:$0xff] }
  0x21   : > { %v3381_v14 = vld [vmem:[%s3802_s7 + $0x60] sm:$0xff]  ;;  %v3380_v17 = vld [vmem:[%s3802_s7 + $0x58] sm:$0xff]  ;;  %v3371_v19 = vld [vmem:[%s3802_s7 + $0x10] sm:$0xff] }
  0x22   : > { %1269 = vmatpush.bf16.msra.mxu0 %v3375_v3  ;;  %v3389_v15 = vld [vmem:[%s3802_s7 + $0xa0] sm:$0xff]  ;;  %v3388_v18 = vld [vmem:[%s3802_s7 + $0x98] sm:$0xff]  ;;  %v3379_v20 = vld [vmem:[%s3802_s7 + $0x50] sm:$0xff] }
  0x23   : > { %1438 = vmatpush.bf16.msra.mxu1 %v3383_v4  ;;  %3265 = vmatmul.msk.bf16.vlgmr.msra.gmra.mxu3 %vm1171_vm0, %v2668_v12  ;;  %v3387_v21 = vld [vmem:[%s3802_s7 + $0x90] sm:$0xff]  ;;  %v3370_v24 = vld [vmem:[%s3802_s7 + $0x8] sm:$0xff]  ;;  %v3369_v31 = vld [vmem:[%s3802_s7] sm:$0xff] }
  0x24   : > { %1607 = vmatpush.bf16.msra.mxu2 %v3391_v5  ;;  %v3378_v25 = vld [vmem:[%s3802_s7 + $0x48] sm:$0xff]  ;;  %v3377_v32 = vld [vmem:[%s3802_s7 + $0x40] sm:$0xff]  ;;  %v2713_v53 = vld [vmem:[%s5151_s1 + $0x78] sm:$0xf0] }
  0x25   : > { %v3386_v26 = vld [vmem:[%s3802_s7 + $0x88] sm:$0xff]  ;;  %v3385_v34 = vld [vmem:[%s3802_s7 + $0x80] sm:$0xff]  ;;  %v3404_v56 = vld [vmem:[%s5151_s1 + $0x4c] sm:$0xf0]  ;;  %s3538_s7 = sshll.u32 %s3705_s18, 7  ;;  %s2511_s18 = sshll.u32 %s5054_s11, 4  ;;  %s2512_s18 = int_to_ptr.vmem [resolvable:$true] %s2511_s18 }
  0x26   : > { %1270 = vmatpush.bf16.msra.mxu0 %v3374_v8  ;;  %v3407_v52 = vld [vmem:[%s5151_s1 + $0x6c] sm:$0xf]  ;;  %v2687_v55 = vld [vmem:[%s5151_s1 + $0x40] sm:$0xf]  ;;  %v3402_v57 = vld [vmem:[%s5151_s1 + $0x44] sm:$0xf]  ;;  %s2510_s21 = scalar_lea.hbm %s5153_s3, %s3538_s7  ;;  %s2528_s26 = scalar_lea.hbm %s5154_s4, %s3538_s7 }
  0x27   : > { %1439 = vmatpush.bf16.msra.mxu1 %v3382_v9  ;;  %v2716_v54 = vor.u32 %v3407_v52, %v2713_v53  ;;  %v2689_v58 = vld [vmem:[%s5151_s1 + $0x50] sm:$0xf0]  ;;  %v2695_v59 = vld [vmem:[%s5151_s1 + $0x48] sm:$0xf]  ;;  %v3405_v60 = vld [vmem:[%s5151_s1 + $0x54] sm:$0xf0]  ;;  %v2688_v61 = vor.u32 %v3404_v56, %v2687_v55 }
  0x28   : > { %1608 = vmatpush.bf16.msra.mxu2 %v3390_v11  ;;  %v2692_v62 = vor.u32 %v3402_v57, %v2689_v58  ;;  %v2696_v63 = vor.u32 %v3405_v60, %v2695_v59  ;;  %v3411_v0 = vld [vmem:[%s5151_s1 + $0x8c] sm:$0xf]  ;;  %v2729_v1 = vld [vmem:[%s5151_s1 + $0x98] sm:$0xf0]  ;;  %v2703_v3 = vld [vmem:[%s5151_s1 + $0x60] sm:$0xf] }
  0x29   : > { %v2732_v2 = vor.u32 %v3411_v0, %v2729_v1  ;;  %v3408_v4 = vld [vmem:[%s5151_s1 + $0x6c] sm:$0xf0]  ;;  %v3406_v5 = vld [vmem:[%s5151_s1 + $0x64] sm:$0xf]  ;;  %v2705_v6 = vld [vmem:[%s5151_s1 + $0x70] sm:$0xf0] }
  0x2a   : > { %1271 = vmatpush.bf16.msra.mxu0 %v3373_v13  ;;  %v2711_v7 = vld [vmem:[%s5151_s1 + $0x68] sm:$0xf]  ;;  %v3409_v8 = vld [vmem:[%s5151_s1 + $0x74] sm:$0xf0]  ;;  %v2704_v9 = vor.u32 %v3408_v4, %v2703_v3  ;;  %v2708_v10 = vor.u32 %v3406_v5, %v2705_v6  ;;  %v3415_v12 = vld [vmem:[%s5151_s1 + $0xac] sm:$0xf] }
  0x2b   : > { %1440 = vmatpush.bf16.msra.mxu1 %v3381_v14  ;;  %v2712_v11 = vor.u32 %v3409_v8, %v2711_v7  ;;  %v2745_v13 = vld [vmem:[%s5151_s1 + $0xb8] sm:$0xf0]  ;;  %v3416_v28 = vld [vmem:[%s5151_s1 + $0xac] sm:$0xf0]  ;;  %v3414_v29 = vld [vmem:[%s5151_s1 + $0xa4] sm:$0xf] }
  0x2c   : > { %1609 = vmatpush.bf16.msra.mxu2 %v3389_v15  ;;  %v2748_v14 = vor.u32 %v3415_v12, %v2745_v13  ;;  %v2719_v15 = vld [vmem:[%s5151_s1 + $0x80] sm:$0xf]  ;;  %v2737_v30 = vld [vmem:[%s5151_s1 + $0xb0] sm:$0xf0]  ;;  %v3423_v36 = vld [vmem:[%s5151_s1 + $0xec] sm:$0xf] }
  0x2d   : > { %v3420_v40 = vld [vmem:[%s5151_s1 + $0xcc] sm:$0xf0]  ;;  %v3418_v41 = vld [vmem:[%s5151_s1 + $0xc4] sm:$0xf]  ;;  %v2759_v43 = vld [vmem:[%s5151_s1 + $0xc8] sm:$0xf] }
  0x2e   : > { %1272 = vmatpush.bf16.msra.mxu0 %v3372_v16  ;;  %v3412_v16 = vld [vmem:[%s5151_s1 + $0x8c] sm:$0xf0]  ;;  %v3421_v44 = vld [vmem:[%s5151_s1 + $0xd4] sm:$0xf0]  ;;  %v3427_v48 = vld [vmem:[%s5151_s1 + $0x10c] sm:$0xf] }
  0x2f   : > { %1441 = vmatpush.bf16.msra.mxu1 %v3380_v17  ;;  %v3410_v17 = vld [vmem:[%s5151_s1 + $0x84] sm:$0xf]  ;;  %v2760_v47 = vor.u32 %v3421_v44, %v2759_v43  ;;  %v3424_v52 = vld [vmem:[%s5151_s1 + $0xec] sm:$0xf0]  ;;  %v2775_v55 = vld [vmem:[%s5151_s1 + $0xe8] sm:$0xf] }
  0x30   : > { %1610 = vmatpush.bf16.msra.mxu2 %v3388_v18  ;;  %v2721_v18 = vld [vmem:[%s5151_s1 + $0x90] sm:$0xf0]  ;;  %v3422_v53 = vld [vmem:[%s5151_s1 + $0xe4] sm:$0xf]  ;;  %v3425_v56 = vld [vmem:[%s5151_s1 + $0xf4] sm:$0xf0] }
  0x31   : > { %v2724_v22 = vor.u32 %v3410_v17, %v2721_v18  ;;  %v2776_v59 = vor.u32 %v3425_v56, %v2775_v55  ;;  %v2783_v1 = vld [vmem:[%s5151_s1 + $0x100] sm:$0xf]  ;;  %v3426_v3 = vld [vmem:[%s5151_s1 + $0x104] sm:$0xf]  ;;  %v2785_v4 = vld [vmem:[%s5151_s1 + $0x110] sm:$0xf0] }
  0x32   : > { %1273 = vmatpush.bf16.msra.mxu0 %v3371_v19  ;;  %v2727_v19 = vld [vmem:[%s5151_s1 + $0x88] sm:$0xf]  ;;  %v3429_v6 = vld [vmem:[%s5151_s1 + $0x114] sm:$0xf0]  ;;  %v2788_v8 = vor.u32 %v3426_v3, %v2785_v4  ;;  %v2857_v3 = vld [vmem:[%s5151_s1 + $0x198] sm:$0xf0] }
  0x33   : > { %1442 = vmatpush.bf16.msra.mxu1 %v3379_v20  ;;  %3266 = vmatmul.msk.bf16.gmra.mxu3 %vm1171_vm0, %v2684_v27  ;;  %v3413_v20 = vld [vmem:[%s5151_s1 + $0x94] sm:$0xf0]  ;;  %v2735_v27 = vld [vmem:[%s5151_s1 + $0xa0] sm:$0xf]  ;;  %v2791_v5 = vld [vmem:[%s5151_s1 + $0x108] sm:$0xf] }
  0x34   : > { %1611 = vmatpush.bf16.msra.mxu2 %v3387_v21  ;;  %v2720_v21 = vor.u32 %v3412_v16, %v2719_v15  ;;  %v2728_v23 = vor.u32 %v3413_v20, %v2727_v19  ;;  %v2736_v33 = vor.u32 %v3416_v28, %v2735_v27  ;;  %v2825_v15 = vld [vmem:[%s5151_s1 + $0x158] sm:$0xf0]  ;;  %v2801_v27 = vld [vmem:[%s5151_s1 + $0x130] sm:$0xf0]  ;;  %v2807_v28 = vld [vmem:[%s5151_s1 + $0x128] sm:$0xf] }
  0x35   : > { %v3437_v55 = vld [vmem:[%s5151_s1 + $0x154] sm:$0xf0]  ;;  %s2513_s29 = sshll.u32 %s2510_s21, 4  ;;  %s2531_s5 = sshll.u32 %s2528_s26, 4  ;;  %s2514_s29 = int_to_ptr.hbm [resolvable:$true] %s2513_s29  ;;  %s5100_s5 = int_to_ptr.hbm [resolvable:$true] %s2531_s5 }
  0x36   : > { %1274 = vmatpush.bf16.msra.mxu0 %v3370_v24  ;;  %v3419_v24 = vld [vmem:[%s5151_s1 + $0xcc] sm:$0xf]  ;;  %s3617_s8 = sshra.s32 %s2514_s29, 4  ;;  %s3618_s8 = int_to_ptr.hbm [resolvable:$true] %s3617_s8 }
  0x37   : > { %1443 = vmatpush.bf16.msra.mxu1 %v3378_v25  ;;  %v2761_v25 = vld [vmem:[%s5151_s1 + $0xd8] sm:$0xf0]  ;;  %s3619_s10 = scalar_lea.hbm %s3618_s8, 128  ;;  %p3624_p1 = scmp.lt.s32.totalorder %s3618_s8, %s5153_s3 }
  0x38   : > { %1612 = vmatpush.bf16.msra.mxu2 %v3386_v26  ;;  %v2764_v26 = vor.u32 %v3419_v24, %v2761_v25  ;;  %v2799_v24 = vld [vmem:[%s5151_s1 + $0x120] sm:$0xf]  ;;  %v3432_v25 = vld [vmem:[%s5151_s1 + $0x12c] sm:$0xf0]  ;;  %p3620_p12 = scmp.ne.s32.totalorder %s3618_s8, %s3619_s10  ;;  %p3625_p2 = scmp.lt.s32.totalorder %s3623_s14, %s3619_s10 }
  0x3a   : > { %1275 = vmatpush.bf16.msra.mxu0 %v3369_v31  ;;  %v2743_v31 = vld [vmem:[%s5151_s1 + $0xa8] sm:$0xf]  ;;  %p3621_p13 = pnand %p3620_p12, %p3782_p4  ;;  %p3626_p3 = por %p3625_p2, %p3624_p1 }
  0x3b   : > { %1444 = vmatpush.bf16.msra.mxu1 %v3377_v32  ;;  %v3417_v32 = vld [vmem:[%s5151_s1 + $0xb4] sm:$0xf0] }
  0x3c   : > { %1613 = vmatpush.bf16.msra.mxu2 %v3385_v34  ;;  %v2740_v34 = vor.u32 %v3414_v29, %v2737_v30  ;;  %v2744_v35 = vor.u32 %v3417_v32, %v2743_v31  ;;  %v3433_v29 = vld [vmem:[%s5151_s1 + $0x134] sm:$0xf0]  ;;  %v2800_v31 = vor.u32 %v3432_v25, %v2799_v24  ;;  %p3622_p0 = pneg %p3621_p13 }
  0x3d   : > { %1276 = vmatmul.bf16.vlgmr.msra.gmra.mxu0 %v2656_v37  ;;  %v2777_v37 = vld [vmem:[%s5151_s1 + $0xf8] sm:$0xf0] }
  0x3e   : > { %1445 = vmatmul.bf16.vlgmr.msra.gmra.mxu1 %v2660_v38  ;;  %v2780_v38 = vor.u32 %v3423_v36, %v2777_v37  ;;  %v2808_v36 = vor.u32 %v3433_v29, %v2807_v28  ;;  %v3447_v29 = vld [vmem:[%s5151_s1 + $0x1ac] sm:$0xf]  ;;  %p3627_p5 = pnand %p3626_p3, %p3622_p0 }
  0x3f   : > { %1614 = vmatmul.bf16.vlgmr.msra.gmra.mxu2 %v2664_v39  ;;  %v2751_v39 = vld [vmem:[%s5151_s1 + $0xc0] sm:$0xf] }
  0x40   : > { %v2752_v45 = vor.u32 %v3420_v40, %v2751_v39  ;;  %v3439_v40 = vld [vmem:[%s5151_s1 + $0x16c] sm:$0xf] }
  0x43   : > { %3267 = vmatmul.msk.bf16.gmra.mxu3 %vm1171_vm0, %v2700_v42  ;;  %v2753_v42 = vld [vmem:[%s5151_s1 + $0xd0] sm:$0xf0] }
  0x44   : > { %v2756_v46 = vor.u32 %v3418_v41, %v2753_v42  ;;  %v2841_v41 = vld [vmem:[%s5151_s1 + $0x178] sm:$0xf0] }
  0x4d   : > { %1281 = vmatmul.bf16.gmra.mxu0 %v2672_v49  ;;  %v2793_v49 = vld [vmem:[%s5151_s1 + $0x118] sm:$0xf0] }
  0x4e   : > { %1450 = vmatmul.bf16.gmra.mxu1 %v2676_v50  ;;  %v2796_v50 = vor.u32 %v3427_v48, %v2793_v49  ;;  %v2844_v48 = vor.u32 %v3439_v40, %v2841_v41  ;;  %v2847_v40 = vld [vmem:[%s5151_s1 + $0x180] sm:$0xf]  ;;  %v3444_v41 = vld [vmem:[%s5151_s1 + $0x18c] sm:$0xf0] }
  0x4f   : > { %1619 = vmatmul.bf16.gmra.mxu2 %v2680_v51  ;;  %v2767_v51 = vld [vmem:[%s5151_s1 + $0xe0] sm:$0xf] }
  0x50   : > { %v2768_v57 = vor.u32 %v3424_v52, %v2767_v51  ;;  %v3436_v51 = vld [vmem:[%s5151_s1 + $0x14c] sm:$0xf0]  ;;  %v3434_v52 = vld [vmem:[%s5151_s1 + $0x144] sm:$0xf] }
  0x53   : > { %3268 = vmatmul.msk.bf16.gmra.mxu3 %vm1171_vm0, %v2716_v54  ;;  %v2769_v54 = vld [vmem:[%s5151_s1 + $0xf0] sm:$0xf0] }
  0x54   : > { %v2772_v58 = vor.u32 %v3422_v53, %v2769_v54  ;;  %v2817_v53 = vld [vmem:[%s5151_s1 + $0x150] sm:$0xf0]  ;;  %v2823_v54 = vld [vmem:[%s5151_s1 + $0x148] sm:$0xf] }
  0x5d   : > { %1286 = vmatmul.bf16.gmra.mxu0 %v2688_v61  ;;  %v3431_v61 = vld [vmem:[%s5151_s1 + $0x12c] sm:$0xf] }
  0x5e   : > { %1455 = vmatmul.bf16.gmra.mxu1 %v2692_v62  ;;  %v2809_v62 = vld [vmem:[%s5151_s1 + $0x138] sm:$0xf0] }
  0x5f   : > { %1624 = vmatmul.bf16.gmra.mxu2 %v2696_v63  ;;  %v2812_v0 = vor.u32 %v3431_v61, %v2809_v62  ;;  %v2824_v62 = vor.u32 %v3437_v55, %v2823_v54 }
  0x63   : > { %3269 = vmatmul.msk.bf16.gmra.mxu3 %vm1171_vm0, %v2732_v2  ;;  %v3428_v2 = vld [vmem:[%s5151_s1 + $0x10c] sm:$0xf0] }
  0x64   : > { %v2784_v7 = vor.u32 %v3428_v2, %v2783_v1  ;;  %v3443_v2 = vld [vmem:[%s5151_s1 + $0x18c] sm:$0xf] }
  0x6d   : > { %1291 = vmatmul.bf16.gmra.mxu0 %v2704_v9 }
  0x6e   : > { %1460 = vmatmul.bf16.gmra.mxu1 %v2708_v10 }
  0x6f   : > { %1629 = vmatmul.bf16.gmra.mxu2 %v2712_v11  ;;  %v2792_v11 = vor.u32 %v3429_v6, %v2791_v5 }
  0x73   : > { %3270 = vmatmul.msk.bf16.gmra.mxu3 %vm1171_vm0, %v2748_v14  ;;  %v3435_v14 = vld [vmem:[%s5151_s1 + $0x14c] sm:$0xf] }
  0x7d   : > { %1296 = vmatmul.bf16.gmra.mxu0 %v2720_v21 }
  0x7e   : > { %1465 = vmatmul.bf16.gmra.mxu1 %v2724_v22  ;;  %v2828_v22 = vor.u32 %v3435_v14, %v2825_v15  ;;  %v3438_v14 = vld [vmem:[%s5151_s1 + $0x164] sm:$0xf]  ;;  %v2833_v15 = vld [vmem:[%s5151_s1 + $0x170] sm:$0xf0] }
  0x7f   : > { %1634 = vmatmul.bf16.gmra.mxu2 %v2728_v23 }
  0x83   : > { %3271 = vmatmul.msk.bf16.gmra.mxu3 %vm1171_vm0, %v2764_v26  ;;  %v3430_v26 = vld [vmem:[%s5151_s1 + $0x124] sm:$0xf] }
  0x84   : > { %v2804_v32 = vor.u32 %v3430_v26, %v2801_v27 }
  0x8d   : > { %1301 = vmatmul.bf16.gmra.mxu0 %v2736_v33 }
  0x8e   : > { %1470 = vmatmul.bf16.gmra.mxu1 %v2740_v34 }
  0x8f   : > { %1639 = vmatmul.bf16.gmra.mxu2 %v2744_v35 }
  0x93   : > { %3272 = vmatmul.msk.bf16.gmra.mxu3 %vm1171_vm0, %v2780_v38 }
  0x9d   : > { %1306 = vmatmul.bf16.gmra.mxu0 %v2752_v45 }
  0x9e   : > { %1475 = vmatmul.bf16.gmra.mxu1 %v2756_v46 }
  0x9f   : > { %1644 = vmatmul.bf16.gmra.mxu2 %v2760_v47 }
  0xa3   : > { %3273 = vmatmul.msk.bf16.gmra.mxu3 %vm1171_vm0, %v2796_v50  ;;  %v2815_v50 = vld [vmem:[%s5151_s1 + $0x140] sm:$0xf] }
  0xa6   : > { %v1784_v60 = vpop.f32.mrf.mxu3 }
  0xad   : > { %1311 = vmatmul.bf16.gmra.mxu0 %v2768_v57  ;;  %v2816_v57 = vor.u32 %v3436_v51, %v2815_v50 }
  0xae   : > { %1480 = vmatmul.bf16.gmra.mxu1 %v2772_v58  ;;  %v1786_v63 = vpop.f32.mrf.mxu3  ;;  %v2820_v58 = vor.u32 %v3434_v52, %v2817_v53 }
  0xaf   : > { %1649 = vmatmul.bf16.gmra.mxu2 %v2776_v59 }
  0xb3   : > { %3274 = vmatmul.msk.bf16.gmra.mxu3 %vm1171_vm0, %v2812_v0 }
  0xb6   : > { %v1789_v13 = vpop.f32.mrf.mxu3 }
  0xba   : > { %v1277_v9 = vpop.f32.mrf.mxu0 }
  0xbb   : > { %v1446_v10 = vpop.f32.mrf.mxu1 }
  0xbc   : > { %v1447_v12 = vadd.f32 %v1446_v10, %v1277_v9  ;;  %v2860_v10 = vor.u32 %v3443_v2, %v2857_v3 }
  0xbd   : > { %1316 = vmatmul.bf16.gmra.mxu0 %v2784_v7 }
  0xbe   : > { %1485 = vmatmul.bf16.gmra.mxu1 %v2788_v8  ;;  %v1791_v21 = vpop.f32.mrf.mxu3 }
  0xbf   : > { %1654 = vmatmul.bf16.gmra.mxu2 %v2792_v11 }
  0xc2   : > { %v1615_v16 = vpop.f32.mrf.mxu2  ;;  %v1279_v18 = vpop.f32.mrf.mxu0 }
  0xc3   : > { %v1616_v17 = vadd.f32 %v1615_v16, %v1447_v12  ;;  %v1448_v19 = vpop.f32.mrf.mxu1  ;;  %3275 = vmatmul.msk.bf16.gmra.mxu3 %vm1171_vm0, %v2828_v22  ;;  %v2831_v12 = vld [vmem:[%s5151_s1 + $0x160] sm:$0xf]  ;;  %v2839_v16 = vld [vmem:[%s5151_s1 + $0x168] sm:$0xf] }
  0xc4   : > { %v1449_v20 = vadd.f32 %v1448_v19, %v1279_v18 }
  0xc5   : > { %v4067_v23 = vadd.f32 %v1784_v60, %v1616_v17  ;;  %v3441_v17 = vld [vmem:[%s5151_s1 + $0x174] sm:$0xf0] }
  0xc6   : > { %v1794_v38 = vpop.f32.mrf.mxu3  ;;  %v2840_v25 = vor.u32 %v3441_v17, %v2839_v16 }
  0xca   : > { %v1617_v30 = vpop.f32.mrf.mxu2  ;;  %v1282_v34 = vpop.f32.mrf.mxu0 }
  0xcb   : > { %v1618_v33 = vadd.f32 %v1617_v30, %v1449_v20  ;;  %v1451_v35 = vpop.f32.mrf.mxu1  ;;  %v2836_v20 = vor.u32 %v3438_v14, %v2833_v15  ;;  %v2873_v30 = vld [vmem:[%s5151_s1 + $0x1b8] sm:$0xf0] }
  0xcc   : > { %v1452_v37 = vadd.f32 %v1451_v35, %v1282_v34 }
  0xcd   : > { %v4088_v39 = vadd.f32 %v1786_v63, %v1618_v33  ;;  %1321 = vmatmul.bf16.gmra.mxu0 %v2800_v31 }
  0xce   : > { %1490 = vmatmul.bf16.gmra.mxu1 %v2804_v32  ;;  %v1796_v47 = vpop.f32.mrf.mxu3 }
  0xcf   : > { %1659 = vmatmul.bf16.gmra.mxu2 %v2808_v36 }
  0xd2   : > { %v1620_v42 = vpop.f32.mrf.mxu2  ;;  %v1284_v44 = vpop.f32.mrf.mxu0 }
  0xd3   : > { %v1621_v43 = vadd.f32 %v1620_v42, %v1452_v37  ;;  %v1453_v45 = vpop.f32.mrf.mxu1  ;;  %3276 = vmatmul.msk.bf16.gmra.mxu3 %vm1171_vm0, %v2844_v48  ;;  %v2876_v37 = vor.u32 %v3447_v29, %v2873_v30  ;;  %v3442_v42 = vld [vmem:[%s5151_s1 + $0x184] sm:$0xf] }
  0xd4   : > { %v1454_v46 = vadd.f32 %v1453_v45, %v1284_v44  ;;  %v2855_v44 = vld [vmem:[%s5151_s1 + $0x188] sm:$0xf]  ;;  %v3445_v45 = vld [vmem:[%s5151_s1 + $0x194] sm:$0xf0] }
  0xd5   : > { %v4096_v49 = vadd.f32 %v1789_v13, %v1621_v43  ;;  %v3440_v13 = vld [vmem:[%s5151_s1 + $0x16c] sm:$0xf0]  ;;  %v2849_v43 = vld [vmem:[%s5151_s1 + $0x190] sm:$0xf0]  ;;  %v2856_v53 = vor.u32 %v3445_v45, %v2855_v44 }
  0xd6   : > { %v1799_v0 = vpop.f32.mrf.mxu3  ;;  %v2832_v19 = vor.u32 %v3440_v13, %v2831_v12  ;;  %v2852_v48 = vor.u32 %v3442_v42, %v2849_v43 }
  0xda   : > { %v1622_v56 = vpop.f32.mrf.mxu2  ;;  %v1287_v60 = vpop.f32.mrf.mxu0 }
  0xdb   : > { %v1623_v59 = vadd.f32 %v1622_v56, %v1454_v46  ;;  %v1456_v61 = vpop.f32.mrf.mxu1 }
  0xdc   : > { %v1457_v63 = vadd.f32 %v1456_v61, %v1287_v60 }
  0xdd   : > { %v4117_v1 = vadd.f32 %v1791_v21, %v1623_v59  ;;  %1326 = vmatmul.bf16.gmra.mxu0 %v2816_v57  ;;  %v3451_v57 = vld [vmem:[%s5151_s1 + $0x1cc] sm:$0xf] }
  0xde   : > { %1495 = vmatmul.bf16.gmra.mxu1 %v2820_v58  ;;  %v1801_v9 = vpop.f32.mrf.mxu3  ;;  %v2889_v58 = vld [vmem:[%s5151_s1 + $0x1d8] sm:$0xf0] }
  0xdf   : > { %1664 = vmatmul.bf16.gmra.mxu2 %v2824_v62  ;;  %v2892_v2 = vor.u32 %v3451_v57, %v2889_v58 }
  0xe2   : > { %v1625_v4 = vpop.f32.mrf.mxu2  ;;  %v1289_v6 = vpop.f32.mrf.mxu0 }
  0xe3   : > { %v1626_v5 = vadd.f32 %v1625_v4, %v1457_v63  ;;  %v1458_v7 = vpop.f32.mrf.mxu1  ;;  %3277 = vmatmul.msk.bf16.gmra.mxu3 %vm1171_vm0, %v2860_v10  ;;  %v2863_v4 = vld [vmem:[%s5151_s1 + $0x1a0] sm:$0xf] }
  0xe4   : > { %v1459_v8 = vadd.f32 %v1458_v7, %v1289_v6  ;;  %v3446_v6 = vld [vmem:[%s5151_s1 + $0x1a4] sm:$0xf]  ;;  %v2865_v7 = vld [vmem:[%s5151_s1 + $0x1b0] sm:$0xf0] }
  0xe5   : > { %v4125_v11 = vadd.f32 %v1794_v38, %v1626_v5  ;;  %v3448_v5 = vld [vmem:[%s5151_s1 + $0x1ac] sm:$0xf0]  ;;  %v2868_v13 = vor.u32 %v3446_v6, %v2865_v7  ;;  %v3457_v6 = vld [vmem:[%s5151_s1 + $0x1f4] sm:$0xf0] }
  0xe6   : > { %v1804_v27 = vpop.f32.mrf.mxu3  ;;  %v2864_v12 = vor.u32 %v3448_v5, %v2863_v4  ;;  %v2897_v4 = vld [vmem:[%s5151_s1 + $0x1f0] sm:$0xf0]  ;;  %v2903_v5 = vld [vmem:[%s5151_s1 + $0x1e8] sm:$0xf] }
  0xea   : > { %v1627_v18 = vpop.f32.mrf.mxu2  ;;  %v1292_v22 = vpop.f32.mrf.mxu0 }
  0xeb   : > { %v1628_v21 = vadd.f32 %v1627_v18, %v1459_v8  ;;  %v1461_v24 = vpop.f32.mrf.mxu1  ;;  %v2871_v8 = vld [vmem:[%s5151_s1 + $0x1a8] sm:$0xf] }
  0xec   : > { %v1462_v26 = vadd.f32 %v1461_v24, %v1292_v22  ;;  %v2905_v22 = vld [vmem:[%s5151_s1 + $0x1f8] sm:$0xf0] }
  0xed   : > { %v4146_v28 = vadd.f32 %v1796_v47, %v1628_v21  ;;  %1331 = vmatmul.bf16.gmra.mxu0 %v2832_v19  ;;  %v2848_v47 = vor.u32 %v3444_v41, %v2847_v40  ;;  %v3455_v21 = vld [vmem:[%s5151_s1 + $0x1ec] sm:$0xf]  ;;  %v3453_v40 = vld [vmem:[%s5151_s1 + $0x1d4] sm:$0xf0] }
  0xee   : > { %1500 = vmatmul.bf16.gmra.mxu1 %v2836_v20  ;;  %v1806_v36 = vpop.f32.mrf.mxu3 }
  0xef   : > { %1669 = vmatmul.bf16.gmra.mxu2 %v2840_v25 }
  0xf2   : > { %v1630_v31 = vpop.f32.mrf.mxu2  ;;  %v1294_v33 = vpop.f32.mrf.mxu0 }
  0xf3   : > { %v1631_v32 = vadd.f32 %v1630_v31, %v1462_v26  ;;  %v1463_v34 = vpop.f32.mrf.mxu1  ;;  %3278 = vmatmul.msk.bf16.gmra.mxu3 %vm1171_vm0, %v2876_v37  ;;  %v2908_v31 = vor.u32 %v3455_v21, %v2905_v22  ;;  %v2887_v37 = vld [vmem:[%s5151_s1 + $0x1c8] sm:$0xf] }
  0xf4   : > { %v1464_v35 = vadd.f32 %v1463_v34, %v1294_v33  ;;  %v2879_v33 = vld [vmem:[%s5151_s1 + $0x1c0] sm:$0xf]  ;;  %v3452_v34 = vld [vmem:[%s5151_s1 + $0x1cc] sm:$0xf0] }
  0xf5   : > { %v4154_v38 = vadd.f32 %v1799_v0, %v1631_v32  ;;  %v2880_v42 = vor.u32 %v3452_v34, %v2879_v33  ;;  %v3460_v33 = vld [vmem:[%s5151_s1 + $0x20c] sm:$0xf0]  ;;  %v3458_v34 = vld [vmem:[%s5151_s1 + $0x204] sm:$0xf] }
  0xf6   : > { %v1809_v55 = vpop.f32.mrf.mxu3 }
  0xfa   : > { %v1632_v46 = vpop.f32.mrf.mxu2  ;;  %v1297_v51 = vpop.f32.mrf.mxu0 }
  0xfb   : > { %v1633_v50 = vadd.f32 %v1632_v46, %v1464_v35  ;;  %v1466_v52 = vpop.f32.mrf.mxu1  ;;  %v3450_v35 = vld [vmem:[%s5151_s1 + $0x1c4] sm:$0xf] }
  0xfc   : > { %v1467_v54 = vadd.f32 %v1466_v52, %v1297_v51  ;;  %v3459_v52 = vld [vmem:[%s5151_s1 + $0x20c] sm:$0xf] }
  0xfd   : > { %v4175_v56 = vadd.f32 %v1801_v9, %v1633_v50  ;;  %1336 = vmatmul.bf16.gmra.mxu0 %v2848_v47  ;;  %v3449_v9 = vld [vmem:[%s5151_s1 + $0x1b4] sm:$0xf0]  ;;  %v2888_v47 = vor.u32 %v3453_v40, %v2887_v37 }
  0xfe   : > { %1505 = vmatmul.bf16.gmra.mxu1 %v2852_v48  ;;  %v1811_v0 = vpop.f32.mrf.mxu3  ;;  %v2872_v17 = vor.u32 %v3449_v9, %v2871_v8  ;;  %v3461_v37 = vld [vmem:[%s5151_s1 + $0x214] sm:$0xf0] }
  0xff   : > { %1674 = vmatmul.bf16.gmra.mxu2 %v2856_v53  ;;  %v2921_v53 = vld [vmem:[%s5151_s1 + $0x218] sm:$0xf0] }
 0x102   : > { %v1635_v59 = vpop.f32.mrf.mxu2  ;;  %v1299_v61 = vpop.f32.mrf.mxu0 }
 0x103   : > { %v1636_v60 = vadd.f32 %v1635_v59, %v1467_v54  ;;  %v1468_v62 = vpop.f32.mrf.mxu1  ;;  %3279 = vmatmul.msk.bf16.gmra.mxu3 %vm1171_vm0, %v2892_v2  ;;  %v3454_v2 = vld [vmem:[%s5151_s1 + $0x1e4] sm:$0xf] }
 0x104   : > { %v1469_v63 = vadd.f32 %v1468_v62, %v1299_v61  ;;  %v2924_v61 = vor.u32 %v3459_v52, %v2921_v53  ;;  %v2900_v9 = vor.u32 %v3454_v2, %v2897_v4  ;;  %v3467_v52 = vld [vmem:[%s5151_s1 + $0x24c] sm:$0xf]  ;;  %v2953_v53 = vld [vmem:[%s5151_s1 + $0x258] sm:$0xf0]  ;;  %v3464_v2 = vld [vmem:[%s5151_s1 + $0x22c] sm:$0xf0] }
 0x105   : > { %v4183_v3 = vadd.f32 %v1804_v27, %v1636_v60  ;;  %v3462_v4 = vld [vmem:[%s5151_s1 + $0x224] sm:$0xf] }
 0x106   : > { %v1814_v19 = vpop.f32.mrf.mxu3 }
 0x10a   : > { %v1637_v10 = vpop.f32.mrf.mxu2  ;;  %v1302_v15 = vpop.f32.mrf.mxu0 }
 0x10b   : > { %v1638_v14 = vadd.f32 %v1637_v10, %v1469_v63  ;;  %v1471_v16 = vpop.f32.mrf.mxu1  ;;  %v2895_v63 = vld [vmem:[%s5151_s1 + $0x1e0] sm:$0xf] }
 0x10c   : > { %v1472_v18 = vadd.f32 %v1471_v16, %v1302_v15 }
 0x10d   : > { %v4204_v20 = vadd.f32 %v1806_v36, %v1638_v14  ;;  %1341 = vmatmul.bf16.gmra.mxu0 %v2864_v12  ;;  %v2881_v36 = vld [vmem:[%s5151_s1 + $0x1d0] sm:$0xf0]  ;;  %v2904_v14 = vor.u32 %v3457_v6, %v2903_v5  ;;  %v2935_v6 = vld [vmem:[%s5151_s1 + $0x228] sm:$0xf] }
 0x10e   : > { %1510 = vmatmul.bf16.gmra.mxu1 %v2868_v13  ;;  %v1816_v30 = vpop.f32.mrf.mxu3  ;;  %v2884_v43 = vor.u32 %v3450_v35, %v2881_v36  ;;  %v2913_v35 = vld [vmem:[%s5151_s1 + $0x210] sm:$0xf0]  ;;  %v2919_v36 = vld [vmem:[%s5151_s1 + $0x208] sm:$0xf] }
 0x10f   : > { %1679 = vmatmul.bf16.gmra.mxu2 %v2872_v17  ;;  %v2929_v5 = vld [vmem:[%s5151_s1 + $0x230] sm:$0xf0] }
 0x112   : > { %v1640_v24 = vpop.f32.mrf.mxu2  ;;  %v1304_v26 = vpop.f32.mrf.mxu0 }
 0x113   : > { %v1641_v25 = vadd.f32 %v1640_v24, %v1472_v18  ;;  %v1473_v27 = vpop.f32.mrf.mxu1  ;;  %3280 = vmatmul.msk.bf16.gmra.mxu3 %vm1171_vm0, %v2908_v31  ;;  %v3463_v18 = vld [vmem:[%s5151_s1 + $0x22c] sm:$0xf]  ;;  %v2911_v31 = vld [vmem:[%s5151_s1 + $0x200] sm:$0xf] }
 0x114   : > { %v1474_v29 = vadd.f32 %v1473_v27, %v1304_v26 }
 0x115   : > { %v4212_v32 = vadd.f32 %v1809_v55, %v1641_v25 }
 0x116   : > { %v1819_v50 = vpop.f32.mrf.mxu3 }
 0x11a   : > { %v1642_v41 = vpop.f32.mrf.mxu2  ;;  %v1307_v45 = vpop.f32.mrf.mxu0 }
 0x11b   : > { %v1643_v44 = vadd.f32 %v1642_v41, %v1474_v29  ;;  %v1476_v46 = vpop.f32.mrf.mxu1  ;;  %v2912_v41 = vor.u32 %v3460_v33, %v2911_v31 }
 0x11c   : > { %v1477_v48 = vadd.f32 %v1476_v46, %v1307_v45  ;;  %v2920_v46 = vor.u32 %v3461_v37, %v2919_v36  ;;  %v3468_v36 = vld [vmem:[%s5151_s1 + $0x24c] sm:$0xf0]  ;;  %v3466_v37 = vld [vmem:[%s5151_s1 + $0x244] sm:$0xf] }
 0x11d   : > { %v4233_v51 = vadd.f32 %v1811_v0, %v1643_v44  ;;  %1346 = vmatmul.bf16.gmra.mxu0 %v2880_v42  ;;  %v3456_v0 = vld [vmem:[%s5151_s1 + $0x1ec] sm:$0xf0]  ;;  %v2916_v42 = vor.u32 %v3458_v34, %v2913_v35  ;;  %v2943_v35 = vld [vmem:[%s5151_s1 + $0x240] sm:$0xf] }
 0x11e   : > { %1515 = vmatmul.bf16.gmra.mxu1 %v2884_v43  ;;  %v1821_v60 = vpop.f32.mrf.mxu3  ;;  %v2896_v8 = vor.u32 %v3456_v0, %v2895_v63  ;;  %v2956_v63 = vor.u32 %v3467_v52, %v2953_v53  ;;  %v2927_v0 = vld [vmem:[%s5151_s1 + $0x220] sm:$0xf] }
 0x11f   : > { %1684 = vmatmul.bf16.gmra.mxu2 %v2888_v47 }
 0x122   : > { %v1645_v54 = vpop.f32.mrf.mxu2  ;;  %v1309_v57 = vpop.f32.mrf.mxu0 }
 0x123   : > { %v1646_v55 = vadd.f32 %v1645_v54, %v1477_v48  ;;  %v1478_v58 = vpop.f32.mrf.mxu1  ;;  %3281 = vmatmul.msk.bf16.gmra.mxu3 %vm1171_vm0, %v2924_v61 }
 0x124   : > { %v1479_v59 = vadd.f32 %v1478_v58, %v1309_v57 }
 0x125   : > { %v4241_v62 = vadd.f32 %v1814_v19, %v1646_v55  ;;  %v2937_v19 = vld [vmem:[%s5151_s1 + $0x238] sm:$0xf0] }
 0x126   : > { %v1824_v16 = vpop.f32.mrf.mxu3  ;;  %v2940_v29 = vor.u32 %v3463_v18, %v2937_v19 }
 0x12a   : > { %v1647_v7 = vpop.f32.mrf.mxu2  ;;  %v1312_v12 = vpop.f32.mrf.mxu0 }
 0x12b   : > { %v1648_v10 = vadd.f32 %v1647_v7, %v1479_v59  ;;  %v1481_v13 = vpop.f32.mrf.mxu1  ;;  %v3465_v7 = vld [vmem:[%s5151_s1 + $0x234] sm:$0xf0] }
 0x12c   : > { %v1482_v15 = vadd.f32 %v1481_v13, %v1312_v12 }
 0x12d   : > { %v4262_v17 = vadd.f32 %v1816_v30, %v1648_v10  ;;  %1351 = vmatmul.bf16.gmra.mxu0 %v2896_v8  ;;  %v2932_v10 = vor.u32 %v3462_v4, %v2929_v5 }
 0x12e   : > { %1520 = vmatmul.bf16.gmra.mxu1 %v2900_v9  ;;  %v1826_v27 = vpop.f32.mrf.mxu3  ;;  %v2928_v9 = vor.u32 %v3464_v2, %v2927_v0 }
 0x12f   : > { %1689 = vmatmul.bf16.gmra.mxu2 %v2904_v14 }
 0x132   : > { %v1650_v21 = vpop.f32.mrf.mxu2  ;;  %v1314_v24 = vpop.f32.mrf.mxu0 }
 0x133   : > { %v1651_v22 = vadd.f32 %v1650_v21, %v1482_v15  ;;  %v1483_v25 = vpop.f32.mrf.mxu1  ;;  %3282 = vmatmul.msk.bf16.gmra.mxu3 %vm1171_vm0, %v2940_v29  ;;  %v2936_v15 = vor.u32 %v3465_v7, %v2935_v6  ;;  %v3471_v21 = vld [vmem:[%s5151_s1 + $0x26c] sm:$0xf]  ;;  %v2959_v7 = vld [vmem:[%s5151_s1 + $0x260] sm:$0xf] }
 0x134   : > { %v1484_v26 = vadd.f32 %v1483_v25, %v1314_v24 }
 0x135   : > { %v4270_v30 = vadd.f32 %v1819_v50, %v1651_v22  ;;  %v2969_v22 = vld [vmem:[%s5151_s1 + $0x278] sm:$0xf0] }
 0x136   : > { %v1829_v48 = vpop.f32.mrf.mxu3  ;;  %v2972_v34 = vor.u32 %v3471_v21, %v2969_v22 }
 0x13a   : > { %v1652_v40 = vpop.f32.mrf.mxu2  ;;  %v1317_v44 = vpop.f32.mrf.mxu0 }
 0x13b   : > { %v1653_v43 = vadd.f32 %v1652_v40, %v1484_v26  ;;  %v1486_v45 = vpop.f32.mrf.mxu1  ;;  %v2945_v40 = vld [vmem:[%s5151_s1 + $0x250] sm:$0xf0] }
 0x13c   : > { %v1487_v47 = vadd.f32 %v1486_v45, %v1317_v44  ;;  %v2944_v44 = vor.u32 %v3468_v36, %v2943_v35  ;;  %v2948_v45 = vor.u32 %v3466_v37, %v2945_v40 }
 0x13d   : > { %v4291_v50 = vadd.f32 %v1821_v60, %v1653_v43  ;;  %1356 = vmatmul.bf16.gmra.mxu0 %v2912_v41  ;;  %v2951_v41 = vld [vmem:[%s5151_s1 + $0x248] sm:$0xf] }
 0x13e   : > { %1525 = vmatmul.bf16.gmra.mxu1 %v2916_v42  ;;  %v1831_v61 = vpop.f32.mrf.mxu3  ;;  %v3469_v42 = vld [vmem:[%s5151_s1 + $0x254] sm:$0xf0] }
 0x13f   : > { %1694 = vmatmul.bf16.gmra.mxu2 %v2920_v46  ;;  %v2952_v52 = vor.u32 %v3469_v42, %v2951_v41 }
 0x142   : > { %v1655_v54 = vpop.f32.mrf.mxu2  ;;  %v1319_v57 = vpop.f32.mrf.mxu0 }
 0x143   : > { %v1656_v55 = vadd.f32 %v1655_v54, %v1487_v47  ;;  %v1488_v58 = vpop.f32.mrf.mxu1  ;;  %3283 = vmatmul.msk.bf16.gmra.mxu3 %vm1171_vm0, %v2956_v63 }
 0x144   : > { %v1489_v59 = vadd.f32 %v1488_v58, %v1319_v57  ;;  %v3475_v57 = vld [vmem:[%s5151_s1 + $0x28c] sm:$0xf]  ;;  %v2985_v58 = vld [vmem:[%s5151_s1 + $0x298] sm:$0xf0] }
 0x145   : > { %v4299_v60 = vadd.f32 %v1824_v16, %v1656_v55  ;;  %v2988_v6 = vor.u32 %v3475_v57, %v2985_v58 }
 0x146   : > { %v1834_v18 = vpop.f32.mrf.mxu3 }
 0x14a   : > { %v1657_v8 = vpop.f32.mrf.mxu2  ;;  %v1322_v13 = vpop.f32.mrf.mxu0 }
 0x14b   : > { %v1658_v12 = vadd.f32 %v1657_v8, %v1489_v59  ;;  %v1491_v14 = vpop.f32.mrf.mxu1  ;;  %v3472_v8 = vld [vmem:[%s5151_s1 + $0x26c] sm:$0xf0] }
 0x14c   : > { %v1492_v16 = vadd.f32 %v1491_v14, %v1322_v13  ;;  %v3473_v13 = vld [vmem:[%s5151_s1 + $0x274] sm:$0xf0] }
 0x14d   : > { %v4320_v19 = vadd.f32 %v1826_v27, %v1658_v12  ;;  %1361 = vmatmul.bf16.gmra.mxu0 %v2928_v9  ;;  %v3470_v9 = vld [vmem:[%s5151_s1 + $0x264] sm:$0xf]  ;;  %v2967_v12 = vld [vmem:[%s5151_s1 + $0x268] sm:$0xf] }
 0x14e   : > { %1530 = vmatmul.bf16.gmra.mxu1 %v2932_v10  ;;  %v1836_v33 = vpop.f32.mrf.mxu3  ;;  %v2961_v10 = vld [vmem:[%s5151_s1 + $0x270] sm:$0xf0] }
 0x14f   : > { %1699 = vmatmul.bf16.gmra.mxu2 %v2936_v15  ;;  %v2960_v15 = vor.u32 %v3472_v8, %v2959_v7  ;;  %v3483_v7 = vld [vmem:[%s5151_s1 + $0x2cc] sm:$0xf]  ;;  %v3017_v8 = vld [vmem:[%s5151_s1 + $0x2d8] sm:$0xf0] }
 0x152   : > { %v1660_v24 = vpop.f32.mrf.mxu2  ;;  %v1324_v26 = vpop.f32.mrf.mxu0 }
 0x153   : > { %v1661_v25 = vadd.f32 %v1660_v24, %v1492_v16  ;;  %v1493_v29 = vpop.f32.mrf.mxu1  ;;  %3284 = vmatmul.msk.bf16.gmra.mxu3 %vm1171_vm0, %v2972_v34  ;;  %v2964_v16 = vor.u32 %v3470_v9, %v2961_v10  ;;  %v2968_v24 = vor.u32 %v3473_v13, %v2967_v12  ;;  %v3001_v34 = vld [vmem:[%s5151_s1 + $0x2b8] sm:$0xf0] }
 0x154   : > { %v1494_v31 = vadd.f32 %v1493_v29, %v1324_v26 }
 0x155   : > { %v4328_v27 = vadd.f32 %v1829_v48, %v1661_v25 }
 0x156   : > { %v1839_v54 = vpop.f32.mrf.mxu3 }
 0x15a   : > { %v1662_v43 = vpop.f32.mrf.mxu2  ;;  %v1327_v47 = vpop.f32.mrf.mxu0 }
 0x15b   : > { %v1663_v46 = vadd.f32 %v1662_v43, %v1494_v31  ;;  %v1496_v48 = vpop.f32.mrf.mxu1  ;;  %v3479_v31 = vld [vmem:[%s5151_s1 + $0x2ac] sm:$0xf] }
 0x15c   : > { %v1497_v53 = vadd.f32 %v1496_v48, %v1327_v47  ;;  %v3004_v43 = vor.u32 %v3479_v31, %v3001_v34  ;;  %v2977_v47 = vld [vmem:[%s5151_s1 + $0x290] sm:$0xf0]  ;;  %v2983_v48 = vld [vmem:[%s5151_s1 + $0x288] sm:$0xf] }
 0x15d   : > { %v4349_v55 = vadd.f32 %v1831_v61, %v1663_v46  ;;  %1366 = vmatmul.bf16.gmra.mxu0 %v2944_v44  ;;  %v2975_v44 = vld [vmem:[%s5151_s1 + $0x280] sm:$0xf]  ;;  %v3474_v46 = vld [vmem:[%s5151_s1 + $0x284] sm:$0xf] }
 0x15e   : > { %1535 = vmatmul.bf16.gmra.mxu1 %v2948_v45  ;;  %v1841_v5 = vpop.f32.mrf.mxu3  ;;  %v3476_v45 = vld [vmem:[%s5151_s1 + $0x28c] sm:$0xf0]  ;;  %v2980_v57 = vor.u32 %v3474_v46, %v2977_v47  ;;  %v3487_v46 = vld [vmem:[%s5151_s1 + $0x2ec] sm:$0xf]  ;;  %v3033_v47 = vld [vmem:[%s5151_s1 + $0x2f8] sm:$0xf0] }
 0x15f   : > { %1704 = vmatmul.bf16.gmra.mxu2 %v2952_v52  ;;  %v3477_v52 = vld [vmem:[%s5151_s1 + $0x294] sm:$0xf0] }
 0x162   : > { %v1665_v59 = vpop.f32.mrf.mxu2  ;;  %v1329_v0 = vpop.f32.mrf.mxu0 }
 0x163   : > { %v1666_v63 = vadd.f32 %v1665_v59, %v1497_v53  ;;  %v1498_v2 = vpop.f32.mrf.mxu1  ;;  %3285 = vmatmul.msk.bf16.gmra.mxu3 %vm1171_vm0, %v2988_v6 }
 0x164   : > { %v1499_v4 = vadd.f32 %v1498_v2, %v1329_v0  ;;  %v2984_v0 = vor.u32 %v3477_v52, %v2983_v48 }
 0x165   : > { %v4357_v61 = vadd.f32 %v1834_v18, %v1666_v63 }
 0x166   : > { %v1844_v26 = vpop.f32.mrf.mxu3 }
 0x16a   : > { %v1667_v14 = vpop.f32.mrf.mxu2  ;;  %v1332_v21 = vpop.f32.mrf.mxu0 }
 0x16b   : > { %v1668_v18 = vadd.f32 %v1667_v14, %v1499_v4  ;;  %v1501_v22 = vpop.f32.mrf.mxu1 }
 0x16c   : > { %v1502_v25 = vadd.f32 %v1501_v22, %v1332_v21  ;;  %v3480_v21 = vld [vmem:[%s5151_s1 + $0x2ac] sm:$0xf0]  ;;  %v3478_v22 = vld [vmem:[%s5151_s1 + $0x2a4] sm:$0xf] }
 0x16d   : > { %v4378_v29 = vadd.f32 %v1836_v33, %v1668_v18  ;;  %1371 = vmatmul.bf16.gmra.mxu0 %v2960_v15  ;;  %v2991_v18 = vld [vmem:[%s5151_s1 + $0x2a0] sm:$0xf] }
 0x16e   : > { %1540 = vmatmul.bf16.gmra.mxu1 %v2964_v16  ;;  %v1846_v42 = vpop.f32.mrf.mxu3  ;;  %v3020_v16 = vor.u32 %v3483_v7, %v3017_v8  ;;  %v2992_v34 = vor.u32 %v3480_v21, %v2991_v18  ;;  %v3009_v7 = vld [vmem:[%s5151_s1 + $0x2d0] sm:$0xf0]  ;;  %v3485_v8 = vld [vmem:[%s5151_s1 + $0x2d4] sm:$0xf0] }
 0x16f   : > { %1709 = vmatmul.bf16.gmra.mxu2 %v2968_v24  ;;  %v2993_v24 = vld [vmem:[%s5151_s1 + $0x2b0] sm:$0xf0] }
 0x172   : > { %v1670_v35 = vpop.f32.mrf.mxu2  ;;  %v1334_v37 = vpop.f32.mrf.mxu0 }
 0x173   : > { %v1671_v36 = vadd.f32 %v1670_v35, %v1502_v25  ;;  %v1503_v40 = vpop.f32.mrf.mxu1  ;;  %3286 = vmatmul.msk.bf16.gmra.mxu3 %vm1171_vm0, %v3004_v43  ;;  %v2999_v25 = vld [vmem:[%s5151_s1 + $0x2a8] sm:$0xf]  ;;  %v2996_v35 = vor.u32 %v3478_v22, %v2993_v24 }
 0x174   : > { %v1504_v41 = vadd.f32 %v1503_v40, %v1334_v37 }
 0x175   : > { %v4386_v33 = vadd.f32 %v1839_v54, %v1671_v36  ;;  %v2976_v54 = vor.u32 %v3476_v45, %v2975_v44 }
 0x176   : > { %v1849_v4 = vpop.f32.mrf.mxu3 }
 0x17a   : > { %v1672_v53 = vpop.f32.mrf.mxu2  ;;  %v1337_v59 = vpop.f32.mrf.mxu0 }
 0x17b   : > { %v1673_v58 = vadd.f32 %v1672_v53, %v1504_v41  ;;  %v1506_v63 = vpop.f32.mrf.mxu1 }
 0x17c   : > { %v1507_v2 = vadd.f32 %v1506_v63, %v1337_v59  ;;  %v3036_v59 = vor.u32 %v3487_v46, %v3033_v47  ;;  %v3007_v63 = vld [vmem:[%s5151_s1 + $0x2c0] sm:$0xf]  ;;  %v3488_v46 = vld [vmem:[%s5151_s1 + $0x2ec] sm:$0xf0]  ;;  %v3486_v47 = vld [vmem:[%s5151_s1 + $0x2e4] sm:$0xf] }
 0x17d   : > { %v4407_v6 = vadd.f32 %v1841_v5, %v1673_v58  ;;  %1376 = vmatmul.bf16.gmra.mxu0 %v2976_v54 }
 0x17e   : > { %1545 = vmatmul.bf16.gmra.mxu1 %v2980_v57  ;;  %v1851_v15 = vpop.f32.mrf.mxu3 }
 0x17f   : > { %1714 = vmatmul.bf16.gmra.mxu2 %v2984_v0  ;;  %v3484_v0 = vld [vmem:[%s5151_s1 + $0x2cc] sm:$0xf0] }
 0x182   : > { %v1675_v9 = vpop.f32.mrf.mxu2  ;;  %v1339_v12 = vpop.f32.mrf.mxu0 }
 0x183   : > { %v1676_v10 = vadd.f32 %v1675_v9, %v1507_v2  ;;  %v1508_v13 = vpop.f32.mrf.mxu1  ;;  %3287 = vmatmul.msk.bf16.gmra.mxu3 %vm1171_vm0, %v3020_v16  ;;  %v3482_v2 = vld [vmem:[%s5151_s1 + $0x2c4] sm:$0xf] }
 0x184   : > { %v1509_v14 = vadd.f32 %v1508_v13, %v1339_v12  ;;  %v3012_v12 = vor.u32 %v3482_v2, %v3009_v7 }
 0x185   : > { %v4415_v5 = vadd.f32 %v1844_v26, %v1676_v10  ;;  %v3481_v26 = vld [vmem:[%s5151_s1 + $0x2b4] sm:$0xf0]  ;;  %v3008_v10 = vor.u32 %v3484_v0, %v3007_v63 }
 0x186   : > { %v3000_v41 = vor.u32 %v3481_v26, %v2999_v25  ;;  %v1854_v44 = vpop.f32.mrf.mxu3  ;;  %v3491_v25 = vld [vmem:[%s5151_s1 + $0x30c] sm:$0xf]  ;;  %v3049_v26 = vld [vmem:[%s5151_s1 + $0x318] sm:$0xf0] }
 0x18a   : > { %v1677_v31 = vpop.f32.mrf.mxu2  ;;  %v1342_v37 = vpop.f32.mrf.mxu0 }
 0x18b   : > { %v1678_v36 = vadd.f32 %v1677_v31, %v1509_v14  ;;  %v1511_v40 = vpop.f32.mrf.mxu1 }
 0x18c   : > { %v1512_v43 = vadd.f32 %v1511_v40, %v1342_v37 }
 0x18d   : > { %v4436_v45 = vadd.f32 %v1846_v42, %v1678_v36  ;;  %1381 = vmatmul.bf16.gmra.mxu0 %v2992_v34 }
 0x18e   : > { %1550 = vmatmul.bf16.gmra.mxu1 %v2996_v35  ;;  %v1856_v58 = vpop.f32.mrf.mxu3 }
 0x18f   : > { %1719 = vmatmul.bf16.gmra.mxu2 %v3000_v41  ;;  %v3052_v41 = vor.u32 %v3491_v25, %v3049_v26  ;;  %v3039_v26 = vld [vmem:[%s5151_s1 + $0x300] sm:$0xf] }
 0x192   : > { %v1680_v48 = vpop.f32.mrf.mxu2  ;;  %v1344_v53 = vpop.f32.mrf.mxu0 }
 0x193   : > { %v1681_v52 = vadd.f32 %v1680_v48, %v1512_v43  ;;  %v1513_v54 = vpop.f32.mrf.mxu1  ;;  %3288 = vmatmul.msk.bf16.gmra.mxu3 %vm1171_vm0, %v3036_v59  ;;  %v3023_v43 = vld [vmem:[%s5151_s1 + $0x2e0] sm:$0xf]  ;;  %v3025_v48 = vld [vmem:[%s5151_s1 + $0x2f0] sm:$0xf0] }
 0x194   : > { %v1514_v57 = vadd.f32 %v1513_v54, %v1344_v53  ;;  %v3024_v54 = vor.u32 %v3488_v46, %v3023_v43 }
 0x195   : > { %v4444_v42 = vadd.f32 %v1849_v4, %v1681_v52  ;;  %v3015_v4 = vld [vmem:[%s5151_s1 + $0x2c8] sm:$0xf]  ;;  %v3489_v52 = vld [vmem:[%s5151_s1 + $0x2f4] sm:$0xf0] }
 0x196   : > { %v3016_v18 = vor.u32 %v3485_v8, %v3015_v4  ;;  %v1859_v22 = vpop.f32.mrf.mxu3 }
 0x19a   : > { %v1682_v9 = vpop.f32.mrf.mxu2  ;;  %v1347_v14 = vpop.f32.mrf.mxu0 }
 0x19b   : > { %v1683_v13 = vadd.f32 %v1682_v9, %v1514_v57  ;;  %v1516_v16 = vpop.f32.mrf.mxu1  ;;  %v3028_v57 = vor.u32 %v3486_v47, %v3025_v48  ;;  %v3495_v9 = vld [vmem:[%s5151_s1 + $0x32c] sm:$0xf] }
 0x19c   : > { %v1517_v21 = vadd.f32 %v1516_v16, %v1347_v14 }
 0x19d   : > { %v4465_v24 = vadd.f32 %v1851_v15, %v1683_v13  ;;  %1386 = vmatmul.bf16.gmra.mxu0 %v3008_v10  ;;  %v3065_v10 = vld [vmem:[%s5151_s1 + $0x338] sm:$0xf0] }
 0x19e   : > { %1555 = vmatmul.bf16.gmra.mxu1 %v3012_v12  ;;  %v1861_v40 = vpop.f32.mrf.mxu3  ;;  %v3068_v25 = vor.u32 %v3495_v9, %v3065_v10 }
 0x19f   : > { %1724 = vmatmul.bf16.gmra.mxu2 %v3016_v18 }
 0x1a2   : > { %v1685_v31 = vpop.f32.mrf.mxu2  ;;  %v1349_v35 = vpop.f32.mrf.mxu0 }
 0x1a3   : > { %v1686_v34 = vadd.f32 %v1685_v31, %v1517_v21  ;;  %v1518_v36 = vpop.f32.mrf.mxu1  ;;  %3289 = vmatmul.msk.bf16.gmra.mxu3 %vm1171_vm0, %v3052_v41  ;;  %v3492_v31 = vld [vmem:[%s5151_s1 + $0x30c] sm:$0xf0] }
 0x1a4   : > { %v1519_v37 = vadd.f32 %v1518_v36, %v1349_v35  ;;  %v3041_v35 = vld [vmem:[%s5151_s1 + $0x310] sm:$0xf0]  ;;  %v3493_v36 = vld [vmem:[%s5151_s1 + $0x314] sm:$0xf0]  ;;  %v3040_v41 = vor.u32 %v3492_v31, %v3039_v26  ;;  %v3063_v31 = vld [vmem:[%s5151_s1 + $0x328] sm:$0xf] }
 0x1a5   : > { %v4473_v15 = vadd.f32 %v1854_v44, %v1686_v34  ;;  %v3031_v44 = vld [vmem:[%s5151_s1 + $0x2e8] sm:$0xf]  ;;  %v3490_v34 = vld [vmem:[%s5151_s1 + $0x304] sm:$0xf] }
 0x1a6   : > { %v3032_v2 = vor.u32 %v3489_v52, %v3031_v44  ;;  %v1864_v4 = vpop.f32.mrf.mxu3  ;;  %v3044_v43 = vor.u32 %v3490_v34, %v3041_v35  ;;  %v3497_v34 = vld [vmem:[%s5151_s1 + $0x334] sm:$0xf0] }
 0x1a7   : > { %5161 = vst [vmem:[#allocation8_spill] sm:$0xff] %v4473_v15 }
 0x1aa   : > { %v1687_v53 = vpop.f32.mrf.mxu2  ;;  %v1352_v63 = vpop.f32.mrf.mxu0 }
 0x1ab   : > { %v1688_v59 = vadd.f32 %v1687_v53, %v1519_v37  ;;  %v1521_v0 = vpop.f32.mrf.mxu1 }
 0x1ac   : > { %v1522_v7 = vadd.f32 %v1521_v0, %v1352_v63 }
 0x1ad   : > { %v4494_v8 = vadd.f32 %v1856_v58, %v1688_v59  ;;  %1391 = vmatmul.bf16.gmra.mxu0 %v3024_v54  ;;  %v3081_v59 = vld [vmem:[%s5151_s1 + $0x358] sm:$0xf0] }
 0x1ae   : > { %1560 = vmatmul.bf16.gmra.mxu1 %v3028_v57  ;;  %v1866_v21 = vpop.f32.mrf.mxu3  ;;  %v3499_v57 = vld [vmem:[%s5151_s1 + $0x34c] sm:$0xf] }
 0x1af   : > { %5162 = vst [vmem:[#allocation9_spill] sm:$0xff] %v4494_v8  ;;  %1729 = vmatmul.bf16.gmra.mxu2 %v3032_v2 }
 0x1b2   : > { %v1690_v12 = vpop.f32.mrf.mxu2  ;;  %v1354_v14 = vpop.f32.mrf.mxu0 }
 0x1b3   : > { %v1691_v13 = vadd.f32 %v1690_v12, %v1522_v7  ;;  %v1523_v16 = vpop.f32.mrf.mxu1  ;;  %3290 = vmatmul.msk.bf16.gmra.mxu3 %vm1171_vm0, %v3068_v25  ;;  %v3494_v25 = vld [vmem:[%s5151_s1 + $0x324] sm:$0xf] }
 0x1b4   : > { %v1524_v18 = vadd.f32 %v1523_v16, %v1354_v14  ;;  %v1944_v14 = vmul.f32 %v4067_v23, %v4067_v23 }
 0x1b5   : > { %v4502_v58 = vadd.f32 %v1859_v22, %v1691_v13  ;;  %v3047_v22 = vld [vmem:[%s5151_s1 + $0x308] sm:$0xf]  ;;  %v3055_v13 = vld [vmem:[%s5151_s1 + $0x320] sm:$0xf] }
 0x1b6   : > { %v3048_v44 = vor.u32 %v3493_v36, %v3047_v22  ;;  %v1869_v53 = vpop.f32.mrf.mxu3 }
 0x1b7   : > { %5163 = vst [vmem:[#allocation10_spill] sm:$0xff] %v4502_v58 }
 0x1ba   : > { %v1692_v37 = vpop.f32.mrf.mxu2  ;;  %v1357_v47 = vpop.f32.mrf.mxu0 }
 0x1bb   : > { %v1693_v46 = vadd.f32 %v1692_v37, %v1524_v18  ;;  %v1526_v48 = vpop.f32.mrf.mxu1  ;;  %v3496_v18 = vld [vmem:[%s5151_s1 + $0x32c] sm:$0xf0] }
 0x1bc   : > { %v1527_v52 = vadd.f32 %v1526_v48, %v1357_v47  ;;  %v3056_v36 = vor.u32 %v3496_v18, %v3055_v13  ;;  %v3064_v47 = vor.u32 %v3497_v34, %v3063_v31  ;;  %v1946_v31 = vmul.f32 %v4096_v49, %v4096_v49 }
 0x1bd   : > { %v4523_v54 = vadd.f32 %v1861_v40, %v1693_v46  ;;  %1396 = vmatmul.bf16.gmra.mxu0 %v3040_v41  ;;  %v3084_v40 = vor.u32 %v3499_v57, %v3081_v59 }
 0x1be   : > { %1565 = vmatmul.bf16.gmra.mxu1 %v3044_v43  ;;  %v4531_v10 = vpop.f32.mrf.mxu3 }
 0x1bf   : > { %5164 = vst [vmem:[#allocation11_spill] sm:$0xff] %v4523_v54  ;;  %1734 = vmatmul.bf16.gmra.mxu2 %v3048_v44 }
 0x1c2   : > { %v1695_v63 = vpop.f32.mrf.mxu2  ;;  %v1359_v2 = vpop.f32.mrf.mxu0 }
 0x1c3   : > { %v1696_v0 = vadd.f32 %v1695_v63, %v1527_v52  ;;  %v1528_v7 = vpop.f32.mrf.mxu1  ;;  %3291 = vmatmul.msk.bf16.gmra.mxu3 %vm1171_vm0, %v3084_v40  ;;  %v1945_v52 = vmul.f32 %v4088_v39, %v4088_v39  ;;  %v3503_v63 = vld [vmem:[%s5151_s1 + $0x36c] sm:$0xf] }
 0x1c4   : > { %v1529_v9 = vadd.f32 %v1528_v7, %v1359_v2 }
 0x1c5   : > { %v1865_v12 = vadd.f32 %v1864_v4, %v1696_v0  ;;  %v3057_v4 = vld [vmem:[%s5151_s1 + $0x330] sm:$0xf0]  ;;  %v3097_v0 = vld [vmem:[%s5151_s1 + $0x378] sm:$0xf0] }
 0x1c6   : > { %v3060_v37 = vor.u32 %v3494_v25, %v3057_v4  ;;  %v3100_v25 = vor.u32 %v3503_v63, %v3097_v0 }
 0x1c7   : > { %v1976_v16 = vmul.f32 %v1865_v12, %v1865_v12  ;;  %v2040_v26 = vmul.f32 %v1865_v12, %v4067_v23  ;;  %v4555_v23 = vpop.f32.mrf.mxu3 }
 0x1c9   : > { %v2008_v35 = vsub.f32 %v1944_v14, %v1976_v16  ;;  %v4566_v7 = vmul.f32 2.0, %v2040_v26  ;;  %v3071_v26 = vld [vmem:[%s5151_s1 + $0x340] sm:$0xf] }
 0x1ca   : > { %v1697_v22 = vpop.f32.mrf.mxu2  ;;  %v1362_v43 = vpop.f32.mrf.mxu0 }
 0x1cb   : > { %v1698_v41 = vadd.f32 %v1697_v22, %v1529_v9  ;;  %v1531_v46 = vpop.f32.mrf.mxu1  ;;  %v3498_v22 = vld [vmem:[%s5151_s1 + $0x344] sm:$0xf] }
 0x1cc   : > { %v1532_v48 = vadd.f32 %v1531_v46, %v1362_v43 }
 0x1cd   : > { %v1867_v44 = vadd.f32 %v1866_v21, %v1698_v41  ;;  %1401 = vmatmul.bf16.gmra.mxu0 %v3056_v36  ;;  %v3501_v41 = vld [vmem:[%s5151_s1 + $0x354] sm:$0xf0] }
 0x1ce   : > { %1570 = vmatmul.bf16.gmra.mxu1 %v3060_v37  ;;  %v3079_v37 = vld [vmem:[%s5151_s1 + $0x348] sm:$0xf] }
 0x1cf   : > { %1739 = vmatmul.bf16.gmra.mxu2 %v3064_v47  ;;  %v1977_v57 = vmul.f32 %v1867_v44, %v1867_v44  ;;  %v2041_v59 = vmul.f32 %v1867_v44, %v4088_v39  ;;  %v4574_v18 = vpop.f32.mrf.mxu3 }
 0x1d1   : > { %v2009_v2 = vsub.f32 %v1945_v52, %v1977_v57  ;;  %v4568_v21 = vmul.f32 2.0, %v2041_v59  ;;  %v3080_v59 = vor.u32 %v3501_v41, %v3079_v37 }
 0x1d2   : > { %v1700_v9 = vpop.f32.mrf.mxu2  ;;  %v1364_v12 = vpop.f32.mrf.mxu0 }
 0x1d3   : > { %v1701_v40 = vadd.f32 %v1700_v9, %v1532_v48  ;;  %v1533_v13 = vpop.f32.mrf.mxu1  ;;  %v4570_v14 = vpack.c.bf16 %v2009_v2, %v2008_v35  ;;  %v3500_v35 = vld [vmem:[%s5151_s1 + $0x34c] sm:$0xf0]  ;;  %3292 = vmatmul.msk.bf16.gmra.mxu3 %vm1171_vm0, %v3100_v25  ;;  %v1947_v2 = vmul.f32 %v4117_v1, %v4117_v1 }
 0x1d4   : > { %v1534_v16 = vadd.f32 %v1533_v13, %v1364_v12  ;;  %v3072_v47 = vor.u32 %v3500_v35, %v3071_v26  ;;  %v3507_v12 = vld [vmem:[%s5151_s1 + $0x38c] sm:$0xf]  ;;  %v3113_v13 = vld [vmem:[%s5151_s1 + $0x398] sm:$0xf0] }
 0x1d5   : > { %v1870_v4 = vadd.f32 %v1869_v53, %v1701_v40  ;;  %v3073_v53 = vld [vmem:[%s5151_s1 + $0x350] sm:$0xf0]  ;;  %v3116_v37 = vor.u32 %v3507_v12, %v3113_v13 }
 0x1d6   : > { %v3076_v48 = vor.u32 %v3498_v22, %v3073_v53 }
 0x1d7   : > { %v1978_v34 = vmul.f32 %v1870_v4, %v1870_v4  ;;  %v2042_v36 = vmul.f32 %v1870_v4, %v4096_v49  ;;  %v4598_v49 = vpop.f32.mrf.mxu3 }
 0x1d9   : > { %v2010_v43 = vsub.f32 %v1946_v31, %v1978_v34  ;;  %v4610_v25 = vmul.f32 2.0, %v2042_v36  ;;  %v3087_v36 = vld [vmem:[%s5151_s1 + $0x360] sm:$0xf] }
 0x1da   : > { %v1702_v46 = vpop.f32.mrf.mxu2  ;;  %v1367_v52 = vpop.f32.mrf.mxu0 }
 0x1db   : > { %v1703_v44 = vadd.f32 %v1702_v46, %v1534_v16  ;;  %v1536_v57 = vpop.f32.mrf.mxu1  ;;  %v1948_v46 = vmul.f32 %v4125_v11, %v4125_v11 }
 0x1dc   : > { %v1537_v63 = vadd.f32 %v1536_v57, %v1367_v52  ;;  %v3095_v52 = vld [vmem:[%s5151_s1 + $0x368] sm:$0xf]  ;;  %v3505_v57 = vld [vmem:[%s5151_s1 + $0x374] sm:$0xf0] }
 0x1dd   : > { %v1872_v0 = vadd.f32 %v4531_v10, %v1703_v44  ;;  %1406 = vmatmul.bf16.gmra.mxu0 %v3072_v47  ;;  %v3096_v13 = vor.u32 %v3505_v57, %v3095_v52 }
 0x1de   : > { %1575 = vmatmul.bf16.gmra.mxu1 %v3076_v48  ;;  %v3502_v48 = vld [vmem:[%s5151_s1 + $0x364] sm:$0xf] }
 0x1df   : > { %1744 = vmatmul.bf16.gmra.mxu2 %v3080_v59  ;;  %v1979_v9 = vmul.f32 %v1872_v0, %v1872_v0  ;;  %v2043_v40 = vmul.f32 %v1872_v0, %v4117_v1  ;;  %v4618_v53 = vpop.f32.mrf.mxu3  ;;  %v1953_v1 = vmul.f32 %v4204_v20, %v4204_v20 }
 0x1e1   : > { %v2011_v16 = vsub.f32 %v1947_v2, %v1979_v9  ;;  %v4612_v10 = vmul.f32 2.0, %v2043_v40 }
 0x1e2   : > { %v1705_v4 = vpop.f32.mrf.mxu2  ;;  %v1369_v31 = vpop.f32.mrf.mxu0 }
 0x1e3   : > { %v1706_v26 = vadd.f32 %v1705_v4, %v1537_v63  ;;  %v1538_v34 = vpop.f32.mrf.mxu1  ;;  %v4614_v35 = vpack.c.bf16 %v2011_v16, %v2010_v43  ;;  %v3504_v43 = vld [vmem:[%s5151_s1 + $0x36c] sm:$0xf0]  ;;  %3293 = vmatmul.msk.bf16.gmra.mxu3 %vm1171_vm0, %v3116_v37  ;;  %v3129_v37 = vld [vmem:[%s5151_s1 + $0x3b8] sm:$0xf0] }
 0x1e4   : > { %v1539_v22 = vadd.f32 %v1538_v34, %v1369_v31  ;;  %v3088_v0 = vor.u32 %v3504_v43, %v3087_v36 }
 0x1e5   : > { %v1875_v41 = vadd.f32 %v4555_v23, %v1706_v26  ;;  %v3089_v23 = vld [vmem:[%s5151_s1 + $0x370] sm:$0xf0]  ;;  %v1949_v26 = vmul.f32 %v4146_v28, %v4146_v28 }
 0x1e6   : > { %v3092_v2 = vor.u32 %v3502_v48, %v3089_v23 }
 0x1e7   : > { %v1980_v47 = vmul.f32 %v1875_v41, %v1875_v41  ;;  %v2044_v44 = vmul.f32 %v1875_v41, %v4125_v11  ;;  %v4643_v11 = vpop.f32.mrf.mxu3 }
 0x1e9   : > { %v2012_v59 = vsub.f32 %v1948_v46, %v1980_v47  ;;  %v4655_v36 = vmul.f32 2.0, %v2044_v44  ;;  %v3103_v44 = vld [vmem:[%s5151_s1 + $0x380] sm:$0xf] }
 0x1ea   : > { %v1707_v63 = vpop.f32.mrf.mxu2  ;;  %v1372_v40 = vpop.f32.mrf.mxu0 }
 0x1eb   : > { %v1708_v9 = vadd.f32 %v1707_v63, %v1539_v22  ;;  %v1541_v12 = vpop.f32.mrf.mxu1  ;;  %v3511_v22 = vld [vmem:[%s5151_s1 + $0x3ac] sm:$0xf] }
 0x1ec   : > { %v1542_v16 = vadd.f32 %v1541_v12, %v1372_v40  ;;  %v3132_v63 = vor.u32 %v3511_v22, %v3129_v37  ;;  %v3506_v40 = vld [vmem:[%s5151_s1 + $0x384] sm:$0xf] }
 0x1ed   : > { %v1877_v4 = vadd.f32 %v4574_v18, %v1708_v9  ;;  %1411 = vmatmul.bf16.gmra.mxu0 %v3088_v0 }
 0x1ee   : > { %1580 = vmatmul.bf16.gmra.mxu1 %v3092_v2  ;;  %v1950_v2 = vmul.f32 %v4154_v38, %v4154_v38 }
 0x1ef   : > { %1749 = vmatmul.bf16.gmra.mxu2 %v3096_v13  ;;  %v1981_v31 = vmul.f32 %v1877_v4, %v1877_v4  ;;  %v2045_v34 = vmul.f32 %v1877_v4, %v4146_v28  ;;  %v4663_v57 = vpop.f32.mrf.mxu3  ;;  %v3111_v13 = vld [vmem:[%s5151_s1 + $0x388] sm:$0xf] }
 0x1f1   : > { %v2013_v41 = vsub.f32 %v1949_v26, %v1981_v31  ;;  %v4657_v18 = vmul.f32 2.0, %v2045_v34 }
 0x1f2   : > { %v1710_v46 = vpop.f32.mrf.mxu2  ;;  %v1374_v43 = vpop.f32.mrf.mxu0 }
 0x1f3   : > { %v1711_v47 = vadd.f32 %v1710_v46, %v1542_v16  ;;  %v1543_v48 = vpop.f32.mrf.mxu1  ;;  %v4659_v23 = vpack.c.bf16 %v2013_v41, %v2012_v59  ;;  %v3508_v59 = vld [vmem:[%s5151_s1 + $0x38c] sm:$0xf0]  ;;  %v3509_v16 = vld [vmem:[%s5151_s1 + $0x394] sm:$0xf0]  ;;  %3294 = vmatmul.msk.bf16.gmra.mxu3 %vm1171_vm0, %v3132_v63 }
 0x1f4   : > { %v1544_v52 = vadd.f32 %v1543_v48, %v1374_v43  ;;  %v3104_v31 = vor.u32 %v3508_v59, %v3103_v44  ;;  %v3112_v46 = vor.u32 %v3509_v16, %v3111_v13  ;;  %v1951_v48 = vmul.f32 %v4175_v56, %v4175_v56  ;;  %v3145_v44 = vld [vmem:[%s5151_s1 + $0x3d8] sm:$0xf0] }
 0x1f5   : > { %v1880_v0 = vadd.f32 %v4598_v49, %v1711_v47  ;;  %v3105_v49 = vld [vmem:[%s5151_s1 + $0x390] sm:$0xf0] }
 0x1f6   : > { %v3108_v34 = vor.u32 %v3506_v40, %v3105_v49 }
 0x1f7   : > { %v1982_v9 = vmul.f32 %v1880_v0, %v1880_v0  ;;  %v2046_v12 = vmul.f32 %v1880_v0, %v4154_v38  ;;  %v4688_v38 = vpop.f32.mrf.mxu3 }
 0x1f9   : > { %v2014_v4 = vsub.f32 %v1950_v2, %v1982_v9  ;;  %v4700_v9 = vmul.f32 2.0, %v2046_v12  ;;  %v3119_v12 = vld [vmem:[%s5151_s1 + $0x3a0] sm:$0xf] }
 0x1fa   : > { %v1712_v26 = vpop.f32.mrf.mxu2  ;;  %v1377_v37 = vpop.f32.mrf.mxu0 }
 0x1fb   : > { %v1713_v22 = vadd.f32 %v1712_v26, %v1544_v52  ;;  %v1546_v41 = vpop.f32.mrf.mxu1  ;;  %v3515_v52 = vld [vmem:[%s5151_s1 + $0x3cc] sm:$0xf] }
 0x1fc   : > { %v1547_v47 = vadd.f32 %v1546_v41, %v1377_v37  ;;  %v3510_v41 = vld [vmem:[%s5151_s1 + $0x3a4] sm:$0xf] }
 0x1fd   : > { %v1882_v43 = vadd.f32 %v4618_v53, %v1713_v22  ;;  %1416 = vmatmul.bf16.gmra.mxu0 %v3104_v31  ;;  %v3148_v31 = vor.u32 %v3515_v52, %v3145_v44  ;;  %v1952_v22 = vmul.f32 %v4183_v3, %v4183_v3 }
 0x1fe   : > { %1585 = vmatmul.bf16.gmra.mxu1 %v3108_v34 }
 0x1ff   : > { %1754 = vmatmul.bf16.gmra.mxu2 %v3112_v46  ;;  %v1983_v63 = vmul.f32 %v1882_v43, %v1882_v43  ;;  %v2047_v0 = vmul.f32 %v1882_v43, %v4175_v56  ;;  %v1891_v26 = vpop.f32.mrf.mxu3  ;;  %v3513_v43 = vld [vmem:[%s5151_s1 + $0x3b4] sm:$0xf0] }
 0x201   : > { %v2015_v2 = vsub.f32 %v1951_v48, %v1983_v63  ;;  %v4702_v53 = vmul.f32 2.0, %v2047_v0 }
 0x202   : > { %v1715_v59 = vpop.f32.mrf.mxu2  ;;  %v1379_v49 = vpop.f32.mrf.mxu0 }
 0x203   : > { %v1716_v40 = vadd.f32 %v1715_v59, %v1547_v47  ;;  %v1548_v13 = vpop.f32.mrf.mxu1  ;;  %v4704_v16 = vpack.c.bf16 %v2015_v2, %v2014_v4  ;;  %v3512_v4 = vld [vmem:[%s5151_s1 + $0x3ac] sm:$0xf0]  ;;  %v3127_v47 = vld [vmem:[%s5151_s1 + $0x3a8] sm:$0xf]  ;;  %3295 = vmatmul.msk.bf16.gmra.mxu3 %vm1171_vm0, %v3148_v31 }
 0x204   : > { %v1549_v48 = vadd.f32 %v1548_v13, %v1379_v49  ;;  %v3120_v52 = vor.u32 %v3512_v4, %v3119_v12  ;;  %v3128_v39 = vor.u32 %v3513_v43, %v3127_v47  ;;  %v3519_v12 = vld [vmem:[%s5151_s1 + $0x3ec] sm:$0xf] }
 0x205   : > { %v1885_v34 = vadd.f32 %v4643_v11, %v1716_v40  ;;  %v3121_v11 = vld [vmem:[%s5151_s1 + $0x3b0] sm:$0xf0] }
 0x206   : > { %v3124_v44 = vor.u32 %v3510_v41, %v3121_v11 }
 0x207   : > { %v1984_v37 = vmul.f32 %v1885_v34, %v1885_v34  ;;  %v2048_v46 = vmul.f32 %v1885_v34, %v4183_v3  ;;  %v4731_v3 = vpop.f32.mrf.mxu3 }
 0x209   : > { %v2016_v63 = vsub.f32 %v1952_v22, %v1984_v37  ;;  %v3161_v22 = vld [vmem:[%s5151_s1 + $0x3f8] sm:$0xf0] }
 0x20a   : > { %v1717_v0 = vpop.f32.mrf.mxu2  ;;  %v1382_v59 = vpop.f32.mrf.mxu0 }
 0x20b   : > { %v1718_v2 = vadd.f32 %v1717_v0, %v1549_v48  ;;  %v1551_v40 = vpop.f32.mrf.mxu1  ;;  %v3164_v48 = vor.u32 %v3519_v12, %v3161_v22 }
 0x20c   : > { %v1552_v13 = vadd.f32 %v1551_v40, %v1382_v59 }
 0x20d   : > { %v1887_v34 = vadd.f32 %v4663_v57, %v1718_v2  ;;  %1421 = vmatmul.bf16.gmra.mxu0 %v3120_v52  ;;  %v4743_v57 = vmul.f32 2.0, %v2048_v46  ;;  %v3135_v52 = vld [vmem:[%s5151_s1 + $0x3c0] sm:$0xf]  ;;  %v3514_v46 = vld [vmem:[%s5151_s1 + $0x3c4] sm:$0xf] }
 0x20e   : > { %1590 = vmatmul.bf16.gmra.mxu1 %v3124_v44  ;;  %v3143_v44 = vld [vmem:[%s5151_s1 + $0x3c8] sm:$0xf]  ;;  %v3517_v2 = vld [vmem:[%s5151_s1 + $0x3d4] sm:$0xf0] }
 0x20f   : > { %1759 = vmatmul.bf16.gmra.mxu2 %v3128_v39  ;;  %v1985_v31 = vmul.f32 %v1887_v34, %v1887_v34  ;;  %v2049_v49 = vmul.f32 %v1887_v34, %v4204_v20  ;;  %v1896_v43 = vpop.f32.mrf.mxu3 }
 0x211   : > { %v2017_v37 = vsub.f32 %v1953_v1, %v1985_v31  ;;  %v4745_v4 = vmul.f32 2.0, %v2049_v49  ;;  %v3516_v1 = vld [vmem:[%s5151_s1 + $0x3cc] sm:$0xf0] }
 0x212   : > { %v1720_v39 = vpop.f32.mrf.mxu2  ;;  %v1384_v41 = vpop.f32.mrf.mxu0  ;;  %v3136_v31 = vor.u32 %v3516_v1, %v3135_v52 }
 0x213   : > { %v1553_v11 = vpop.f32.mrf.mxu1  ;;  %v4747_v47 = vpack.c.bf16 %v2017_v37, %v2016_v63  ;;  %v1721_v0 = vadd.f32 %v1720_v39, %v1552_v13  ;;  %v3137_v63 = vld [vmem:[%s5151_s1 + $0x3d0] sm:$0xf0]  ;;  %3296 = vmatmul.msk.bf16.gmra.mxu3 %vm1171_vm0, %v3164_v48  ;;  %v3144_v37 = vor.u32 %v3517_v2, %v3143_v44  ;;  %v1954_v48 = vmul.f32 %v4212_v32, %v4212_v32 }
 0x214   : > { %v1554_v40 = vadd.f32 %v1553_v11, %v1384_v41  ;;  %v3140_v49 = vor.u32 %v3514_v46, %v3137_v63 }
 0x215   : > { %v1890_v59 = vadd.f32 %v4688_v38, %v1721_v0  ;;  %v1955_v38 = vmul.f32 %v4233_v51, %v4233_v51 }
 0x217   : > { %v1899_v39 = vpop.f32.mrf.mxu3  ;;  %v1986_v28 = vmul.f32 %v1890_v59, %v1890_v59  ;;  %v2050_v20 = vmul.f32 %v1890_v59, %v4212_v32 }
 0x219   : > { %v2018_v52 = vsub.f32 %v1954_v48, %v1986_v28  ;;  %v4777_v46 = vmul.f32 2.0, %v2050_v20  ;;  %v3520_v28 = vld [vmem:[%s5151_s1 + $0x3ec] sm:$0xf0]  ;;  %v3153_v20 = vld [vmem:[%s5151_s1 + $0x3f0] sm:$0xf0] }
 0x21a   : > { %v1722_v34 = vpop.f32.mrf.mxu2  ;;  %v1387_v12 = vpop.f32.mrf.mxu0 }
 0x21b   : > { %v1723_v13 = vadd.f32 %v1722_v34, %v1554_v40  ;;  %v1556_v22 = vpop.f32.mrf.mxu1 }
 0x21c   : > { %v1557_v0 = vadd.f32 %v1556_v22, %v1387_v12 }
 0x21d   : > { %v1892_v56 = vadd.f32 %v1891_v26, %v1723_v13  ;;  %1426 = vmatmul.bf16.gmra.mxu0 %v3136_v31  ;;  %v3521_v13 = vld [vmem:[%s5151_s1 + $0x3f4] sm:$0xf0] }
 0x21e   : > { %1595 = vmatmul.bf16.gmra.mxu1 %v3140_v49  ;;  %v3159_v49 = vld [vmem:[%s5151_s1 + $0x3e8] sm:$0xf] }
 0x21f   : > { %1764 = vmatmul.bf16.gmra.mxu2 %v3144_v37  ;;  %v1987_v41 = vmul.f32 %v1892_v56, %v1892_v56  ;;  %v2051_v11 = vmul.f32 %v1892_v56, %v4233_v51  ;;  %v1901_v34 = vpop.f32.mrf.mxu3  ;;  %v3151_v51 = vld [vmem:[%s5151_s1 + $0x3e0] sm:$0xf]  ;;  %v3518_v56 = vld [vmem:[%s5151_s1 + $0x3e4] sm:$0xf] }
 0x220   : > { %v3152_v37 = vor.u32 %v3520_v28, %v3151_v51  ;;  %v3156_v48 = vor.u32 %v3518_v56, %v3153_v20 }
 0x221   : > { %v2019_v1 = vsub.f32 %v1955_v38, %v1987_v41  ;;  %v4779_v26 = vmul.f32 2.0, %v2051_v11 }
 0x222   : > { %v1725_v63 = vpop.f32.mrf.mxu2  ;;  %v1389_v44 = vpop.f32.mrf.mxu0 }
 0x223   : > { %v1558_v2 = vpop.f32.mrf.mxu1  ;;  %v4781_v59 = vpack.c.bf16 %v2019_v1, %v2018_v52  ;;  %v1726_v40 = vadd.f32 %v1725_v63, %v1557_v0  ;;  %v3160_v0 = vor.u32 %v3521_v13, %v3159_v49 }
 0x224   : > { %v1559_v12 = vadd.f32 %v1558_v2, %v1389_v44  ;;  %v1957_v44 = vmul.f32 %v4262_v17, %v4262_v17 }
 0x225   : > { %v1895_v31 = vadd.f32 %v4731_v3, %v1726_v40  ;;  %v1956_v40 = vmul.f32 %v4241_v62, %v4241_v62 }
 0x227   : > { %v1988_v52 = vmul.f32 %v1895_v31, %v1895_v31  ;;  %v1904_v1 = vpop.f32.mrf.mxu3  ;;  %v2052_v3 = vmul.f32 %v1895_v31, %v4241_v62 }
 0x229   : > { %v2020_v28 = vsub.f32 %v1956_v40, %v1988_v52  ;;  %v2084_v49 = vmul.f32 2.0, %v2052_v3  ;;  %v1959_v3 = vmul.f32 %v4291_v50, %v4291_v50 }
 0x22a   : > { %v1727_v22 = vpop.f32.mrf.mxu2  ;;  %v1392_v41 = vpop.f32.mrf.mxu0 }
 0x22b   : > { %v1728_v38 = vadd.f32 %v1727_v22, %v1559_v12  ;;  %v1561_v11 = vpop.f32.mrf.mxu1 }
 0x22c   : > { %v1562_v56 = vadd.f32 %v1561_v11, %v1392_v41 }
 0x22d   : > { %v1897_v63 = vadd.f32 %v1896_v43, %v1728_v38  ;;  %1431 = vmatmul.bf16.gmra.mxu0 %v3152_v37 }
 0x22e   : > { %1600 = vmatmul.bf16.gmra.mxu1 %v3156_v48 }
 0x22f   : > { %1769 = vmatmul.bf16.gmra.mxu2 %v3160_v0  ;;  %v1989_v2 = vmul.f32 %v1897_v63, %v1897_v63  ;;  %v2053_v51 = vmul.f32 %v1897_v63, %v4262_v17  ;;  %v1906_v62 = vpop.f32.mrf.mxu3  ;;  %v1958_v63 = vmul.f32 %v4270_v30, %v4270_v30 }
 0x231   : > { %v2021_v20 = vsub.f32 %v1957_v44, %v1989_v2  ;;  %v2085_v13 = vmul.f32 2.0, %v2053_v51 }
 0x232   : > { %v1730_v43 = vpop.f32.mrf.mxu2  ;;  %v1394_v12 = vpop.f32.mrf.mxu0 }
 0x233   : > { %v1563_v31 = vpop.f32.mrf.mxu1  ;;  %v2126_v22 = vpack.c.bf16 %v2021_v20, %v2020_v28  ;;  %v2320_v38 = vpack.c.bf16 %v2085_v13, %v2084_v49  ;;  %v1731_v37 = vadd.f32 %v1730_v43, %v1562_v56 }
 0x234   : > { %v1564_v0 = vadd.f32 %v1563_v31, %v1394_v12 }
 0x235   : > { %v1900_v48 = vadd.f32 %v1899_v39, %v1731_v37 }
 0x237   : > { %v1909_v17 = vpop.f32.mrf.mxu3  ;;  %v1990_v52 = vmul.f32 %v1900_v48, %v1900_v48  ;;  %v2054_v11 = vmul.f32 %v1900_v48, %v4270_v30  ;;  %v1960_v30 = vmul.f32 %v4299_v60, %v4299_v60 }
 0x239   : > { %v2022_v44 = vsub.f32 %v1958_v63, %v1990_v52 }
 0x23a   : > { %v1732_v32 = vpop.f32.mrf.mxu2  ;;  %v1397_v58 = vpop.f32.mrf.mxu0 }
 0x23b   : > { %v1733_v54 = vadd.f32 %v1732_v32, %v1564_v0  ;;  %v1566_v8 = vpop.f32.mrf.mxu1  ;;  %v2086_v32 = vmul.f32 2.0, %v2054_v11 }
 0x23c   : > { %v1567_v15 = vadd.f32 %v1566_v8, %v1397_v58 }
 0x23d   : > { %v1902_v41 = vadd.f32 %v1901_v34, %v1733_v54 }
 0x23f   : > { %v1991_v40 = vmul.f32 %v1902_v41, %v1902_v41  ;;  %v2055_v39 = vmul.f32 %v1902_v41, %v4291_v50  ;;  %v1911_v20 = vpop.f32.mrf.mxu3 }
 0x241   : > { %v2023_v2 = vsub.f32 %v1959_v3, %v1991_v40  ;;  %v2087_v51 = vmul.f32 2.0, %v2055_v39 }
 0x242   : > { %v1735_v28 = vpop.f32.mrf.mxu2  ;;  %v1399_v58 = vpop.f32.mrf.mxu0 }
 0x243   : > { %v1736_v8 = vadd.f32 %v1735_v28, %v1567_v15  ;;  %v1568_v56 = vpop.f32.mrf.mxu1  ;;  %v2127_v54 = vpack.c.bf16 %v2023_v2, %v2022_v44  ;;  %v2321_v34 = vpack.c.bf16 %v2087_v51, %v2086_v32  ;;  %v5168_v28 = vpack.c.bf16 %v4657_v18, %v4655_v36 }
 0x244   : > { %v1569_v43 = vadd.f32 %v1568_v56, %v1399_v58  ;;  %v5170_v18 = vpack.c.bf16 %v4568_v21, %v4566_v7  ;;  %v1964_v7 = vmul.f32 %v4357_v61, %v4357_v61 }
 0x245   : > { %v1905_v49 = vadd.f32 %v1904_v1, %v1736_v8  ;;  %2216 = vmatpush.bf16.msrb.mxu3 %v2127_v54  ;;  %2330 = vmatpush.bf16.msrb.mxu1 %v2321_v34  ;;  %v5165_v1 = vpack.c.bf16 %v4779_v26, %v4777_v46 }
 0x247   : > { %v1992_v13 = vmul.f32 %v1905_v49, %v1905_v49  ;;  %v2056_v50 = vmul.f32 %v1905_v49, %v4299_v60  ;;  %v1914_v41 = vpop.f32.mrf.mxu3  ;;  %v1961_v60 = vmul.f32 %v4320_v19, %v4320_v19 }
 0x249   : > { %2217 = vmatpush.bf16.msrb.mxu3 %v2126_v22  ;;  %2331 = vmatpush.bf16.msrb.mxu1 %v2320_v38  ;;  %v2024_v12 = vsub.f32 %v1960_v30, %v1992_v13  ;;  %v5166_v38 = vpack.c.bf16 %v4745_v4, %v4743_v57  ;;  %v4830_v63 = vmul.f32 2.0, %v2056_v50  ;;  %v5167_v57 = vpack.c.bf16 %v4702_v53, %v4700_v9 }
 0x24a   : > { %v1737_v31 = vpop.f32.mrf.mxu2  ;;  %v1402_v37 = vpop.f32.mrf.mxu0  ;;  %v1962_v4 = vmul.f32 %v4328_v27, %v4328_v27 }
 0x24b   : > { %v1738_v15 = vadd.f32 %v1737_v31, %v1569_v43  ;;  %v1571_v48 = vpop.f32.mrf.mxu1 }
 0x24c   : > { %v1572_v0 = vadd.f32 %v1571_v48, %v1402_v37 }
 0x24d   : > { %v1907_v52 = vadd.f32 %v1906_v62, %v1738_v15  ;;  %2218 = vmatpush.bf16.msrb.mxu3 %v4781_v59  ;;  %2332 = vmatpush.bf16.msrb.mxu1 %v5165_v1 }
 0x24f   : > { %v1993_v11 = vmul.f32 %v1907_v52, %v1907_v52  ;;  %v2057_v22 = vmul.f32 %v1907_v52, %v4320_v19  ;;  %v1916_v32 = vpop.f32.mrf.mxu3 }
 0x251   : > { %2219 = vmatpush.bf16.msrb.mxu3 %v4747_v47  ;;  %2333 = vmatpush.bf16.msrb.mxu1 %v5166_v38  ;;  %v2025_v62 = vsub.f32 %v1961_v60, %v1993_v11  ;;  %v4832_v59 = vmul.f32 2.0, %v2057_v22  ;;  %v1965_v11 = vmul.f32 %v4378_v29, %v4378_v29 }
 0x252   : > { %v1740_v46 = vpop.f32.mrf.mxu2  ;;  %v1404_v3 = vpop.f32.mrf.mxu0 }
 0x253   : > { %v1741_v26 = vadd.f32 %v1740_v46, %v1572_v0  ;;  %v1573_v40 = vpop.f32.mrf.mxu1  ;;  %v4834_v39 = vpack.c.bf16 %v2025_v62, %v2024_v12  ;;  %v2322_v19 = vpack.c.bf16 %v4832_v59, %v4830_v63  ;;  %v3309_v63 = vld [vmem:[%s5152_s2 + $0x18] sm:$0xf0] }
 0x254   : > { %v1574_v51 = vadd.f32 %v1573_v40, %v1404_v3 }
 0x255   : > { %v1910_v44 = vadd.f32 %v1909_v17, %v1741_v26  ;;  %2220 = vmatpush.bf16.msrb.mxu3 %v4704_v16  ;;  %2334 = vmatpush.bf16.msrb.mxu1 %v5167_v57 }
 0x257   : > { %v1994_v47 = vmul.f32 %v1910_v44, %v1910_v44  ;;  %v2058_v2 = vmul.f32 %v1910_v44, %v4328_v27  ;;  %v5169_v27 = vpack.c.bf16 %v4612_v10, %v4610_v25  ;;  %v1919_v25 = vpop.f32.mrf.mxu3 }
 0x259   : > { %2221 = vmatpush.bf16.msrb.mxu3 %v4659_v23  ;;  %2335 = vmatpush.bf16.msrb.mxu1 %v5168_v28  ;;  %v2026_v17 = vsub.f32 %v1962_v4, %v1994_v47  ;;  %v1963_v23 = vmul.f32 %v4349_v55, %v4349_v55 }
 0x25a   : > { %v1742_v16 = vpop.f32.mrf.mxu2  ;;  %v1407_v58 = vpop.f32.mrf.mxu0 }
 0x25b   : > { %v1743_v8 = vadd.f32 %v1742_v16, %v1574_v51  ;;  %v1576_v9 = vpop.f32.mrf.mxu1 }
 0x25c   : > { %v1577_v53 = vadd.f32 %v1576_v9, %v1407_v58 }
 0x25d   : > { %v1912_v56 = vadd.f32 %v1911_v20, %v1743_v8  ;;  %2222 = vmatpush.bf16.msrb.mxu3 %v4614_v35  ;;  %2336 = vmatpush.bf16.msrb.mxu1 %v5169_v27  ;;  %v4860_v20 = vmul.f32 2.0, %v2058_v2  ;;  %v1966_v2 = vmul.f32 %v4386_v33, %v4386_v33 }
 0x25f   : > { %v1995_v54 = vmul.f32 %v1912_v56, %v1912_v56  ;;  %v2059_v36 = vmul.f32 %v1912_v56, %v4349_v55  ;;  %v1921_v1 = vpop.f32.mrf.mxu3  ;;  %v1967_v56 = vmul.f32 %v4407_v6, %v4407_v6 }
 0x261   : > { %2223 = vmatpush.bf16.msrb.mxu3 %v4570_v14  ;;  %2337 = vmatpush.bf16.msrb.mxu1 %v5170_v18  ;;  %v2027_v34 = vsub.f32 %v1963_v23, %v1995_v54  ;;  %v4862_v35 = vmul.f32 2.0, %v2059_v36 }
 0x262   : > { %v1745_v49 = vpop.f32.mrf.mxu2  ;;  %v1409_v30 = vpop.f32.mrf.mxu0 }
 0x263   : > { %v1746_v10 = vadd.f32 %v1745_v49, %v1577_v53  ;;  %v1578_v13 = vpop.f32.mrf.mxu1  ;;  %v4864_v50 = vpack.c.bf16 %v2027_v34, %v2026_v17  ;;  %v2323_v55 = vpack.c.bf16 %v4862_v35, %v4860_v20  ;;  %v3323_v20 = vld [vmem:[%s5152_s2 + $0x30] sm:$0xf]  ;;  %v3529_v35 = vld [vmem:[%s5152_s2 + $0x34] sm:$0xf0] }
 0x264   : > { %v1579_v12 = vadd.f32 %v1578_v13, %v1409_v30 }
 0x265   : > { %v1915_v14 = vadd.f32 %v1914_v41, %v1746_v10 }
 0x267   : > { %v1996_v21 = vmul.f32 %v1915_v14, %v1915_v14  ;;  %v2060_v43 = vmul.f32 %v1915_v14, %v4357_v61  ;;  %v1924_v47 = vpop.f32.mrf.mxu3 }
 0x269   : > { %v2028_v31 = vsub.f32 %v1964_v7, %v1996_v21  ;;  %v4874_v62 = vmul.f32 2.0, %v2060_v43  ;;  %v1968_v7 = vmul.f32 %v4415_v5, %v4415_v5 }
 0x26a   : > { %v1747_v15 = vpop.f32.mrf.mxu2  ;;  %v1412_v48 = vpop.f32.mrf.mxu0 }
 0x26b   : > { %v1748_v37 = vadd.f32 %v1747_v15, %v1579_v12  ;;  %v1581_v0 = vpop.f32.mrf.mxu1 }
 0x26c   : > { %v1582_v52 = vadd.f32 %v1581_v0, %v1412_v48 }
 0x26d   : > { %v1917_v60 = vadd.f32 %v1916_v32, %v1748_v37 }
 0x26f   : > { %v1997_v22 = vmul.f32 %v1917_v60, %v1917_v60  ;;  %v2061_v41 = vmul.f32 %v1917_v60, %v4378_v29  ;;  %v1926_v54 = vpop.f32.mrf.mxu3  ;;  %v1969_v60 = vmul.f32 %v4436_v45, %v4436_v45 }
 0x271   : > { %v2029_v38 = vsub.f32 %v1965_v11, %v1997_v22  ;;  %v4876_v46 = vmul.f32 2.0, %v2061_v41 }
 0x272   : > { %v1750_v61 = vpop.f32.mrf.mxu2  ;;  %v1414_v3 = vpop.f32.mrf.mxu0 }
 0x273   : > { %v1751_v26 = vadd.f32 %v1750_v61, %v1582_v52  ;;  %v1583_v40 = vpop.f32.mrf.mxu1  ;;  %v4878_v44 = vpack.c.bf16 %v2029_v38, %v2028_v31  ;;  %v2324_v57 = vpack.c.bf16 %v4876_v46, %v4874_v62  ;;  %v3526_v46 = vld [vmem:[%s5152_s2 + $0x24] sm:$0xf] }
 0x274   : > { %v1584_v51 = vadd.f32 %v1583_v40, %v1414_v3 }
 0x275   : > { %v1920_v4 = vadd.f32 %v1919_v25, %v1751_v26 }
 0x277   : > { %v1998_v29 = vmul.f32 %v1920_v4, %v1920_v4  ;;  %v2062_v32 = vmul.f32 %v1920_v4, %v4386_v33  ;;  %v1929_v15 = vpop.f32.mrf.mxu3 }
 0x279   : > { %v2030_v28 = vsub.f32 %v1966_v2, %v1998_v29  ;;  %v4888_v18 = vmul.f32 2.0, %v2062_v32 }
 0x27a   : > { %v1752_v17 = vpop.f32.mrf.mxu2  ;;  %v1417_v8 = vpop.f32.mrf.mxu0 }
 0x27b   : > { %v1753_v16 = vadd.f32 %v1752_v17, %v1584_v51  ;;  %v1586_v58 = vpop.f32.mrf.mxu1 }
 0x27c   : > { %v1587_v9 = vadd.f32 %v1586_v58, %v1417_v8 }
 0x27d   : > { %v1922_v53 = vadd.f32 %v1921_v1, %v1753_v16 }
 0x27f   : > { %v1999_v27 = vmul.f32 %v1922_v53, %v1922_v53  ;;  %v2063_v23 = vmul.f32 %v1922_v53, %v4407_v6  ;;  %v1970_v53 = vmul.f32 %v4444_v42, %v4444_v42 }
 0x281   : > { %v2031_v36 = vsub.f32 %v1967_v56, %v1999_v27  ;;  %v4890_v34 = vmul.f32 2.0, %v2063_v23  ;;  %v1971_v27 = vmul.f32 %v4465_v24, %v4465_v24 }
 0x282   : > { %v1755_v33 = vpop.f32.mrf.mxu2  ;;  %v1419_v25 = vpop.f32.mrf.mxu0 }
 0x283   : > { %v1756_v49 = vadd.f32 %v1755_v33, %v1587_v9  ;;  %v1588_v10 = vpop.f32.mrf.mxu1  ;;  %v4892_v30 = vpack.c.bf16 %v2031_v36, %v2030_v28  ;;  %v2325_v13 = vpack.c.bf16 %v4890_v34, %v4888_v18  ;;  %v3522_v18 = vld [vmem:[%s5152_s2 + $0x4] sm:$0xf] }
 0x284   : > { %v1589_v43 = vadd.f32 %v1588_v10, %v1419_v25 }
 0x285   : > { %v1925_v14 = vadd.f32 %v1924_v47, %v1756_v49  ;;  %v1931_v47 = vpop.f32.mrf.mxu3 }
 0x287   : > { %v2000_v6 = vmul.f32 %v1925_v14, %v1925_v14  ;;  %v2064_v21 = vmul.f32 %v1925_v14, %v4415_v5 }
 0x289   : > { %v2032_v12 = vsub.f32 %v1968_v7, %v2000_v6  ;;  %v4902_v38 = vmul.f32 2.0, %v2064_v21 }
 0x28a   : > { %v1757_v31 = vpop.f32.mrf.mxu2  ;;  %v1422_v48 = vpop.f32.mrf.mxu0 }
 0x28b   : > { %v1758_v37 = vadd.f32 %v1757_v31, %v1589_v43  ;;  %v1591_v0 = vpop.f32.mrf.mxu1 }
 0x28c   : > { %v1592_v22 = vadd.f32 %v1591_v0, %v1422_v48 }
 0x28d   : > { %v1927_v52 = vadd.f32 %v1926_v54, %v1758_v37  ;;  %v1934_v9 = vpop.f32.mrf.mxu3 }
 0x28f   : > { %v2001_v1 = vmul.f32 %v1927_v52, %v1927_v52  ;;  %v2065_v11 = vmul.f32 %v1927_v52, %v4436_v45 }
 0x291   : > { %v2033_v41 = vsub.f32 %v1969_v60, %v2001_v1  ;;  %v4904_v61 = vmul.f32 2.0, %v2065_v11  ;;  %v5171_v1 = vld [vmem:[#allocation8_spill] sm:$0xff] }
 0x292   : > { %v1760_v5 = vpop.f32.mrf.mxu2  ;;  %v1424_v26 = vpop.f32.mrf.mxu0  ;;  %v1972_v11 = vmul.f32 %v5171_v1, %v5171_v1 }
 0x293   : > { %v1593_v3 = vpop.f32.mrf.mxu1  ;;  %v4906_v40 = vpack.c.bf16 %v2033_v41, %v2032_v12  ;;  %v2326_v4 = vpack.c.bf16 %v4904_v61, %v4902_v38  ;;  %v1761_v2 = vadd.f32 %v1760_v5, %v1592_v22  ;;  %v5172_v41 = vld [vmem:[#allocation9_spill] sm:$0xff]  ;;  %v3533_v38 = vld [vmem:[%s5152_s2 + $0x54] sm:$0xf0] }
 0x294   : > { %v1594_v32 = vadd.f32 %v1593_v3, %v1424_v26  ;;  %v1973_v5 = vmul.f32 %v5172_v41, %v5172_v41 }
 0x295   : > { %v1930_v29 = vadd.f32 %v1929_v15, %v1761_v2  ;;  %v1936_v12 = vpop.f32.mrf.mxu3 }
 0x297   : > { %v2002_v16 = vmul.f32 %v1930_v29, %v1930_v29  ;;  %v2066_v58 = vmul.f32 %v1930_v29, %v4444_v42 }
 0x299   : > { %v2034_v36 = vsub.f32 %v1970_v53, %v2002_v16  ;;  %v4916_v49 = vmul.f32 2.0, %v2066_v58 }
 0x29a   : > { %v1762_v51 = vpop.f32.mrf.mxu2  ;;  %v1427_v28 = vpop.f32.mrf.mxu0 }
 0x29b   : > { %v1763_v45 = vadd.f32 %v1762_v51, %v1594_v32  ;;  %v1596_v17 = vpop.f32.mrf.mxu1 }
 0x29c   : > { %v1597_v54 = vadd.f32 %v1596_v17, %v1427_v28 }
 0x29d   : > { %v1932_v8 = vadd.f32 %v1931_v47, %v1763_v45  ;;  %v1939_v51 = vpop.f32.mrf.mxu3 }
 0x29f   : > { %v2003_v56 = vmul.f32 %v1932_v8, %v1932_v8  ;;  %v2067_v23 = vmul.f32 %v1932_v8, %v4465_v24 }
 0x2a1   : > { %v2035_v33 = vsub.f32 %v1971_v27, %v2003_v56  ;;  %v4918_v25 = vmul.f32 2.0, %v2067_v23  ;;  %v3299_v56 = vld [vmem:[%s5152_s2] sm:$0xf]  ;;  %v3523_v27 = vld [vmem:[%s5152_s2 + $0x4] sm:$0xf0] }
 0x2a2   : > { %v1765_v10 = vpop.f32.mrf.mxu2  ;;  %v1429_v14 = vpop.f32.mrf.mxu0 }
 0x2a3   : > { %v1598_v7 = vpop.f32.mrf.mxu1  ;;  %v2133_v6 = vpack.c.bf16 %v2035_v33, %v2034_v36  ;;  %v2327_v42 = vpack.c.bf16 %v4918_v25, %v4916_v49  ;;  %v1766_v21 = vadd.f32 %v1765_v10, %v1597_v54  ;;  %v3300_v54 = vor.u32 %v3523_v27, %v3299_v56  ;;  %v5173_v10 = vld [vmem:[#allocation10_spill] sm:$0xff] }
 0x2a4   : > { %v1599_v31 = vadd.f32 %v1598_v7, %v1429_v14  ;;  %v1974_v7 = vmul.f32 %v5173_v10, %v5173_v10  ;;  %v3536_v27 = vld [vmem:[%s5152_s2 + $0x74] sm:$0xf] }
 0x2a5   : > { %v1935_v43 = vadd.f32 %v1934_v9, %v1766_v21  ;;  %v1941_v33 = vpop.f32.mrf.mxu3  ;;  %2224 = vmatmul.bf16.vlgmr.msrb.gmra.mxu3 %v3300_v54  ;;  %2338 = vmatmul.bf16.vlgmr.msrb.gmra.mxu1 %v3300_v54 }
 0x2a7   : > { %v2004_v37 = vmul.f32 %v1935_v43, %v1935_v43  ;;  %v2068_v60 = vmul.f32 %v1935_v43, %v5171_v1  ;;  %v5174_v43 = vld [vmem:[#allocation11_spill] sm:$0xff]  ;;  %v3307_v1 = vld [vmem:[%s5152_s2 + $0x10] sm:$0xf] }
 0x2a9   : > { %v2036_v3 = vsub.f32 %v1972_v11, %v2004_v37  ;;  %v2100_v29 = vmul.f32 2.0, %v2068_v60  ;;  %v3525_v60 = vld [vmem:[%s5152_s2 + $0x14] sm:$0xf0] }
 0x2aa   : > { %v1767_v15 = vpop.f32.mrf.mxu2  ;;  %v1432_v48 = vpop.f32.mrf.mxu0  ;;  %v3308_v11 = vor.u32 %v3525_v60, %v3307_v1 }
 0x2ab   : > { %v1768_v24 = vadd.f32 %v1767_v15, %v1599_v31  ;;  %v1601_v0 = vpop.f32.mrf.mxu1 }
 0x2ac   : > { %v1602_v47 = vadd.f32 %v1601_v0, %v1432_v48 }
 0x2ad   : > { %v1937_v52 = vadd.f32 %v1936_v12, %v1768_v24  ;;  %v1975_v12 = vmul.f32 %v5174_v43, %v5174_v43 }
 0x2af   : > { %v2005_v22 = vmul.f32 %v1937_v52, %v1937_v52  ;;  %v2069_v26 = vmul.f32 %v1937_v52, %v5172_v41 }
 0x2b1   : > { %v2037_v2 = vsub.f32 %v1973_v5, %v2005_v22  ;;  %v2101_v32 = vmul.f32 2.0, %v2069_v26  ;;  %v3315_v22 = vld [vmem:[%s5152_s2 + $0x20] sm:$0xf]  ;;  %v3535_v26 = vld [vmem:[%s5152_s2 + $0x64] sm:$0xf0] }
 0x2b2   : > { %v1770_v45 = vpop.f32.mrf.mxu2  ;;  %v1434_v8 = vpop.f32.mrf.mxu0  ;;  %v3347_v5 = vld [vmem:[%s5152_s2 + $0x60] sm:$0xf] }
 0x2b3   : > { %v2134_v28 = vpack.c.bf16 %v2037_v2, %v2036_v3  ;;  %v2328_v17 = vpack.c.bf16 %v2101_v32, %v2100_v29  ;;  %v1771_v16 = vadd.f32 %v1770_v45, %v1602_v47  ;;  %v1603_v58 = vpop.f32.mrf.mxu1  ;;  %v3348_v3 = vor.u32 %v3535_v26, %v3347_v5  ;;  %v3530_v47 = vld [vmem:[%s5152_s2 + $0x44] sm:$0xf]  ;;  %v3333_v2 = vld [vmem:[%s5152_s2 + $0x48] sm:$0xf0]  ;;  %v3355_v32 = vld [vmem:[%s5152_s2 + $0x70] sm:$0xf] }
 0x2b4   : > { %v1604_v53 = vadd.f32 %v1603_v58, %v1434_v8  ;;  %v3336_v29 = vor.u32 %v3530_v47, %v3333_v2  ;;  %v3534_v8 = vld [vmem:[%s5152_s2 + $0x64] sm:$0xf]  ;;  %v3349_v58 = vld [vmem:[%s5152_s2 + $0x68] sm:$0xf0] }
 0x2b5   : > { %v1940_v9 = vadd.f32 %v1939_v51, %v1771_v16  ;;  %2229 = vmatmul.bf16.gmra.mxu3 %v3308_v11  ;;  %2343 = vmatmul.bf16.gmra.mxu1 %v3308_v11  ;;  %v3537_v51 = vld [vmem:[%s5152_s2 + $0x74] sm:$0xf0] }
 0x2b6   : > { %v3356_v45 = vor.u32 %v3537_v51, %v3355_v32 }
 0x2b7   : > { %v2006_v49 = vmul.f32 %v1940_v9, %v1940_v9  ;;  %v2070_v14 = vmul.f32 %v1940_v9, %v5173_v10  ;;  %v3352_v9 = vor.u32 %v3534_v8, %v3349_v58 }
 0x2b9   : > { %v2038_v15 = vsub.f32 %v1974_v7, %v2006_v49  ;;  %v2102_v37 = vmul.f32 2.0, %v2070_v14 }
 0x2ba   : > { %v1772_v23 = vpop.f32.mrf.mxu2 }
 0x2bb   : > { %v1773_v36 = vadd.f32 %v1772_v23, %v1604_v53  ;;  %v3357_v23 = vld [vmem:[%s5152_s2 + $0x78] sm:$0xf0] }
 0x2bc   : > { %v3360_v54 = vor.u32 %v3536_v27, %v3357_v23 }
 0x2bd   : > { %v1942_v25 = vadd.f32 %v1941_v33, %v1773_v36 }
 0x2bf   : > { %v2007_v21 = vmul.f32 %v1942_v25, %v1942_v25  ;;  %v2071_v31 = vmul.f32 %v1942_v25, %v5174_v43 }
 0x2c1   : > { %v2039_v24 = vsub.f32 %v1975_v12, %v2007_v21  ;;  %v2103_v48 = vmul.f32 2.0, %v2071_v31 }
 0x2c3   : > { %v2135_v0 = vpack.c.bf16 %v2039_v24, %v2038_v15  ;;  %v2329_v52 = vpack.c.bf16 %v2103_v48, %v2102_v37 }
 0x2c5   : > { %2265 = vmatpush.bf16.msrb.mxu0 %v2135_v0  ;;  %2379 = vmatpush.bf16.msrb.mxu2 %v2329_v52 }
 0x2c9   : > { %2266 = vmatpush.bf16.msrb.mxu0 %v2134_v28  ;;  %2380 = vmatpush.bf16.msrb.mxu2 %v2328_v17  ;;  %v3532_v28 = vld [vmem:[%s5152_s2 + $0x54] sm:$0xf]  ;;  %v3341_v17 = vld [vmem:[%s5152_s2 + $0x58] sm:$0xf0] }
 0x2ca   : > { %v3344_v16 = vor.u32 %v3532_v28, %v3341_v17 }
 0x2cd   : > { %2267 = vmatpush.bf16.msrb.mxu0 %v2133_v6  ;;  %2381 = vmatpush.bf16.msrb.mxu2 %v2327_v42  ;;  %v3527_v6 = vld [vmem:[%s5152_s2 + $0x24] sm:$0xf0] }
 0x2ce   : > { %v3316_v42 = vor.u32 %v3527_v6, %v3315_v22 }
 0x2d0   : > { %2234 = vmatmul.bf16.gmra.mxu3 %v3316_v42  ;;  %2348 = vmatmul.bf16.gmra.mxu1 %v3316_v42 }
 0x2d1   : > { %2268 = vmatpush.bf16.msrb.mxu0 %v4906_v40  ;;  %2382 = vmatpush.bf16.msrb.mxu2 %v2326_v4  ;;  %v3528_v40 = vld [vmem:[%s5152_s2 + $0x34] sm:$0xf]  ;;  %v3325_v4 = vld [vmem:[%s5152_s2 + $0x38] sm:$0xf0] }
 0x2d2   : > { %v3328_v41 = vor.u32 %v3528_v40, %v3325_v4 }
 0x2d5   : > { %2269 = vmatpush.bf16.msrb.mxu0 %v4892_v30  ;;  %2383 = vmatpush.bf16.msrb.mxu2 %v2325_v13  ;;  %v3339_v13 = vld [vmem:[%s5152_s2 + $0x50] sm:$0xf] }
 0x2d6   : > { %v3340_v61 = vor.u32 %v3533_v38, %v3339_v13 }
 0x2d9   : > { %2270 = vmatpush.bf16.msrb.mxu0 %v4878_v44  ;;  %2384 = vmatpush.bf16.msrb.mxu2 %v2324_v57  ;;  %v3301_v44 = vld [vmem:[%s5152_s2 + $0x8] sm:$0xf0] }
 0x2da   : > { %v3304_v34 = vor.u32 %v3522_v18, %v3301_v44  ;;  %v3317_v57 = vld [vmem:[%s5152_s2 + $0x28] sm:$0xf0] }
 0x2db   : > { %v3320_v30 = vor.u32 %v3526_v46, %v3317_v57 }
 0x2dd   : > { %2271 = vmatpush.bf16.msrb.mxu0 %v4864_v50  ;;  %2385 = vmatpush.bf16.msrb.mxu2 %v2323_v55  ;;  %v3324_v50 = vor.u32 %v3529_v35, %v3323_v20  ;;  %v3531_v55 = vld [vmem:[%s5152_s2 + $0x44] sm:$0xf0] }
 0x2e0   : > { %2239 = vmatmul.bf16.gmra.mxu3 %v3324_v50  ;;  %2353 = vmatmul.bf16.gmra.mxu1 %v3324_v50 }
 0x2e1   : > { %2272 = vmatpush.bf16.msrb.mxu0 %v4834_v39  ;;  %2386 = vmatpush.bf16.msrb.mxu2 %v2322_v19  ;;  %v3524_v39 = vld [vmem:[%s5152_s2 + $0x14] sm:$0xf]  ;;  %v3331_v19 = vld [vmem:[%s5152_s2 + $0x40] sm:$0xf] }
 0x2e2   : > { %v3312_v59 = vor.u32 %v3524_v39, %v3309_v63  ;;  %v3332_v62 = vor.u32 %v3531_v55, %v3331_v19 }
 0x2e4   : > { %2387 = vmatmul.bf16.vlgmr.msrb.gmra.mxu2 %v3304_v34  ;;  %2273 = vmatmul.bf16.vlgmr.msrb.gmra.mxu0 %v3304_v34 }
 0x2f0   : > { %2244 = vmatmul.bf16.gmra.mxu3 %v3332_v62  ;;  %2358 = vmatmul.bf16.gmra.mxu1 %v3332_v62 }
 0x2f4   : > { %2392 = vmatmul.bf16.gmra.mxu2 %v3312_v59  ;;  %2278 = vmatmul.bf16.gmra.mxu0 %v3312_v59 }
 0x300   : > { %2249 = vmatmul.bf16.gmra.mxu3 %v3340_v61  ;;  %2363 = vmatmul.bf16.gmra.mxu1 %v3340_v61 }
 0x304   : > { %2397 = vmatmul.bf16.gmra.mxu2 %v3320_v30  ;;  %2283 = vmatmul.bf16.gmra.mxu0 %v3320_v30 }
 0x310   : > { %2254 = vmatmul.bf16.gmra.mxu3 %v3348_v3  ;;  %2368 = vmatmul.bf16.gmra.mxu1 %v3348_v3 }
 0x314   : > { %2402 = vmatmul.bf16.gmra.mxu2 %v3328_v41  ;;  %2288 = vmatmul.bf16.gmra.mxu0 %v3328_v41 }
 0x320   : > { %2259 = vmatmul.bf16.gmra.mxu3 %v3356_v45  ;;  %2373 = vmatmul.bf16.gmra.mxu1 %v3356_v45 }
 0x322   : > { %v2339_v56 = vpop.f32.mrf.mxu1 }
 0x324   : > { %2407 = vmatmul.bf16.gmra.mxu2 %v3336_v29  ;;  %2293 = vmatmul.bf16.gmra.mxu0 %v3336_v29 }
 0x328   : > { %v2225_v53 = vpop.f32.mrf.mxu3 }
 0x32a   : > { %v2341_v33 = vpop.f32.mrf.mxu1 }
 0x330   : > { %v2227_v36 = vpop.f32.mrf.mxu3 }
 0x332   : > { %v2344_v25 = vpop.f32.mrf.mxu1 }
 0x334   : > { %2412 = vmatmul.bf16.gmra.mxu2 %v3344_v16  ;;  %2298 = vmatmul.bf16.gmra.mxu0 %v3344_v16 }
 0x338   : > { %v2230_v49 = vpop.f32.mrf.mxu3 }
 0x33a   : > { %v2346_v43 = vpop.f32.mrf.mxu1 }
 0x340   : > { %v2232_v7 = vpop.f32.mrf.mxu3 }
 0x344   : > { %2417 = vmatmul.bf16.gmra.mxu2 %v3352_v9  ;;  %2303 = vmatmul.bf16.gmra.mxu0 %v3352_v9 }
 0x34d   : > { %v2349_v60 = vpop.f32.mrf.mxu1 }
 0x353   : > { %v2235_v52 = vpop.f32.mrf.mxu3 }
 0x354   : > { %2422 = vmatmul.bf16.gmra.mxu2 %v3360_v54  ;;  %2308 = vmatmul.bf16.gmra.mxu0 %v3360_v54 }
 0x355   : > { %v2351_v50 = vpop.f32.mrf.mxu1 }
 0x35b   : > { %v2237_v35 = vpop.f32.mrf.mxu3 }
 0x35d   : > { %v2354_v57 = vpop.f32.mrf.mxu1 }
 0x361   : > { %v2274_v10 = vpop.f32.mrf.mxu0 }
 0x362   : > { %v2275_v14 = vadd.f32 %v2274_v10, %v2225_v53 }
 0x363   : > { %v2240_v46 = vpop.f32.mrf.mxu3 }
 0x365   : > { %v2356_v26 = vpop.f32.mrf.mxu1 }
 0x367   : > { %v2388_v21 = vpop.f32.mrf.mxu2 }
 0x368   : > { %v2389_v12 = vadd.f32 %v2388_v21, %v2339_v56 }
 0x369   : > { %v2276_v31 = vpop.f32.mrf.mxu0 }
 0x36a   : > { %v2428_v15 = vsub.f32 %v2275_v14, %v2389_v12  ;;  %v2460_v24 = vadd.f32 %v2389_v12, %v2275_v14  ;;  %v2277_v48 = vadd.f32 %v2276_v31, %v2227_v36 }
 0x36b   : > { %v2242_v41 = vpop.f32.mrf.mxu3 }
 0x36c   : > { %2444 = vst [vmem:[%s5054_s11] sm:$0xff] %v2428_v15 }
 0x36d   : > { %2476 = vst [vmem:[%s5057_s12] sm:$0xff] %v2460_v24  ;;  %v2359_v8 = vpop.f32.mrf.mxu1 }
 0x36f   : > { %v2390_v37 = vpop.f32.mrf.mxu2 }
 0x370   : > { %v2391_v0 = vadd.f32 %v2390_v37, %v2341_v33 }
 0x371   : > { %v2279_v1 = vpop.f32.mrf.mxu0 }
 0x372   : > { %v2429_v11 = vsub.f32 %v2277_v48, %v2391_v0  ;;  %v2461_v22 = vadd.f32 %v2391_v0, %v2277_v48  ;;  %v2280_v6 = vadd.f32 %v2279_v1, %v2230_v49 }
 0x373   : > { %v2245_v17 = vpop.f32.mrf.mxu3 }
 0x374   : > { %2445 = vst [vmem:[%s5054_s11 + $0x8] sm:$0xff] %v2429_v11 }
 0x375   : > { %2477 = vst [vmem:[%s5057_s12 + $0x8] sm:$0xff] %v2461_v22  ;;  %v2361_v49 = vpop.f32.mrf.mxu1 }
 0x377   : > { %v2393_v42 = vpop.f32.mrf.mxu2 }
 0x378   : > { %v2394_v18 = vadd.f32 %v2393_v42, %v2344_v25 }
 0x379   : > { %v2281_v44 = vpop.f32.mrf.mxu0 }
 0x37a   : > { %v2430_v34 = vsub.f32 %v2280_v6, %v2394_v18  ;;  %v2462_v20 = vadd.f32 %v2394_v18, %v2280_v6  ;;  %v2282_v63 = vadd.f32 %v2281_v44, %v2232_v7 }
 0x37b   : > { %v2247_v33 = vpop.f32.mrf.mxu3 }
 0x37c   : > { %2446 = vst [vmem:[%s5054_s11 + $0x10] sm:$0xff] %v2430_v34 }
 0x37d   : > { %2478 = vst [vmem:[%s5057_s12 + $0x10] sm:$0xff] %v2462_v20  ;;  %v2364_v31 = vpop.f32.mrf.mxu1 }
 0x37f   : > { %v2395_v39 = vpop.f32.mrf.mxu2 }
 0x380   : > { %v2396_v59 = vadd.f32 %v2395_v39, %v2346_v43 }
 0x381   : > { %v2284_v19 = vpop.f32.mrf.mxu0 }
 0x382   : > { %v2431_v55 = vsub.f32 %v2282_v63, %v2396_v59  ;;  %v2463_v62 = vadd.f32 %v2396_v59, %v2282_v63  ;;  %v2285_v30 = vadd.f32 %v2284_v19, %v2235_v52 }
 0x383   : > { %v2250_v12 = vpop.f32.mrf.mxu3 }
 0x384   : > { %2447 = vst [vmem:[%s5054_s11 + $0x18] sm:$0xff] %v2431_v55 }
 0x385   : > { %2479 = vst [vmem:[%s5057_s12 + $0x18] sm:$0xff] %v2463_v62  ;;  %v2366_v22 = vpop.f32.mrf.mxu1 }
 0x387   : > { %v2398_v13 = vpop.f32.mrf.mxu2 }
 0x388   : > { %v2399_v38 = vadd.f32 %v2398_v13, %v2349_v60 }
 0x389   : > { %v2286_v61 = vpop.f32.mrf.mxu0 }
 0x38a   : > { %v2432_v40 = vsub.f32 %v2285_v30, %v2399_v38  ;;  %v2464_v4 = vadd.f32 %v2399_v38, %v2285_v30  ;;  %v2287_v3 = vadd.f32 %v2286_v61, %v2237_v35 }
 0x38b   : > { %v2252_v60 = vpop.f32.mrf.mxu3 }
 0x38c   : > { %2448 = vst [vmem:[%s5054_s11 + $0x20] sm:$0xff] %v2432_v40 }
 0x38d   : > { %2480 = vst [vmem:[%s5057_s12 + $0x20] sm:$0xff] %v2464_v4  ;;  %v2369_v63 = vpop.f32.mrf.mxu1 }
 0x38f   : > { %v2400_v5 = vpop.f32.mrf.mxu2 }
 0x390   : > { %v2401_v47 = vadd.f32 %v2400_v5, %v2351_v50 }
 0x391   : > { %v2289_v2 = vpop.f32.mrf.mxu0 }
 0x392   : > { %v2433_v29 = vsub.f32 %v2287_v3, %v2401_v47  ;;  %v2465_v32 = vadd.f32 %v2401_v47, %v2287_v3  ;;  %v2290_v51 = vadd.f32 %v2289_v2, %v2240_v46 }
 0x393   : > { %v2255_v50 = vpop.f32.mrf.mxu3 }
 0x394   : > { %2449 = vst [vmem:[%s5054_s11 + $0x28] sm:$0xff] %v2433_v29 }
 0x395   : > { %2481 = vst [vmem:[%s5057_s12 + $0x28] sm:$0xff] %v2465_v32  ;;  %v2371_v61 = vpop.f32.mrf.mxu1 }
 0x397   : > { %v2403_v45 = vpop.f32.mrf.mxu2 }
 0x398   : > { %v2404_v28 = vadd.f32 %v2403_v45, %v2354_v57 }
 0x399   : > { %v2291_v16 = vpop.f32.mrf.mxu0 }
 0x39a   : > { %v2434_v58 = vsub.f32 %v2290_v51, %v2404_v28  ;;  %v2466_v9 = vadd.f32 %v2404_v28, %v2290_v51  ;;  %v2292_v56 = vadd.f32 %v2291_v16, %v2242_v41 }
 0x39b   : > { %v2257_v38 = vpop.f32.mrf.mxu3 }
 0x39c   : > { %2450 = vst [vmem:[%s5054_s11 + $0x30] sm:$0xff] %v2434_v58 }
 0x39d   : > { %2482 = vst [vmem:[%s5057_s12 + $0x30] sm:$0xff] %v2466_v9  ;;  %v2374_v2 = vpop.f32.mrf.mxu1 }
 0x39f   : > { %v2405_v53 = vpop.f32.mrf.mxu2 }
 0x3a0   : > { %v2406_v27 = vadd.f32 %v2405_v53, %v2356_v26 }
 0x3a1   : > { %v2294_v23 = vpop.f32.mrf.mxu0 }
 0x3a2   : > { %v2435_v54 = vsub.f32 %v2292_v56, %v2406_v27  ;;  %v2467_v36 = vadd.f32 %v2406_v27, %v2292_v56  ;;  %v2295_v25 = vadd.f32 %v2294_v23, %v2245_v17 }
 0x3a3   : > { %v2260_v47 = vpop.f32.mrf.mxu3 }
 0x3a4   : > { %2451 = vst [vmem:[%s5054_s11 + $0x38] sm:$0xff] %v2435_v54 }
 0x3a5   : > { %2483 = vst [vmem:[%s5057_s12 + $0x38] sm:$0xff] %v2467_v36 }
 0x3a7   : > { %v2408_v10 = vpop.f32.mrf.mxu2 }
 0x3a8   : > { %v2409_v14 = vadd.f32 %v2408_v10, %v2359_v8  ;;  %v2376_v8 = vpop.f32.mrf.mxu1 }
 0x3a9   : > { %v2296_v7 = vpop.f32.mrf.mxu0 }
 0x3aa   : > { %v2436_v21 = vsub.f32 %v2295_v25, %v2409_v14  ;;  %v2468_v43 = vadd.f32 %v2409_v14, %v2295_v25  ;;  %v2297_v24 = vadd.f32 %v2296_v7, %v2247_v33 }
 0x3ab   : > { %v2262_v16 = vpop.f32.mrf.mxu3 }
 0x3ac   : > { %2452 = vst [vmem:[%s5054_s11 + $0x40] sm:$0xff] %v2436_v21 }
 0x3ad   : > { %2484 = vst [vmem:[%s5057_s12 + $0x40] sm:$0xff] %v2468_v43 }
 0x3af   : > { %v2410_v15 = vpop.f32.mrf.mxu2 }
 0x3b0   : > { %v2411_v37 = vadd.f32 %v2410_v15, %v2361_v49 }
 0x3b1   : > { %v2299_v48 = vpop.f32.mrf.mxu0 }
 0x3b2   : > { %v2437_v0 = vsub.f32 %v2297_v24, %v2411_v37  ;;  %v2469_v52 = vadd.f32 %v2411_v37, %v2297_v24  ;;  %v2300_v1 = vadd.f32 %v2299_v48, %v2250_v12 }
 0x3b4   : > { %2453 = vst [vmem:[%s5054_s11 + $0x48] sm:$0xff] %v2437_v0 }
 0x3b5   : > { %2485 = vst [vmem:[%s5057_s12 + $0x48] sm:$0xff] %v2469_v52 }
 0x3b7   : > { %v2413_v11 = vpop.f32.mrf.mxu2 }
 0x3b8   : > { %v2414_v6 = vadd.f32 %v2413_v11, %v2364_v31 }
 0x3b9   : > { %v2301_v42 = vpop.f32.mrf.mxu0 }
 0x3ba   : > { %v2438_v18 = vsub.f32 %v2300_v1, %v2414_v6  ;;  %v2470_v44 = vadd.f32 %v2414_v6, %v2300_v1  ;;  %v2302_v20 = vadd.f32 %v2301_v42, %v2252_v60 }
 0x3bc   : > { %2454 = vst [vmem:[%s5054_s11 + $0x50] sm:$0xff] %v2438_v18 }
 0x3bd   : > { %2486 = vst [vmem:[%s5057_s12 + $0x50] sm:$0xff] %v2470_v44 }
 0x3bf   : > { %v2415_v34 = vpop.f32.mrf.mxu2 }
 0x3c0   : > { %v2416_v35 = vadd.f32 %v2415_v34, %v2366_v22 }
 0x3c1   : > { %v2304_v39 = vpop.f32.mrf.mxu0 }
 0x3c2   : > { %v2439_v59 = vsub.f32 %v2302_v20, %v2416_v35  ;;  %v2471_v19 = vadd.f32 %v2416_v35, %v2302_v20  ;;  %v2305_v55 = vadd.f32 %v2304_v39, %v2255_v50 }
 0x3c4   : > { %2455 = vst [vmem:[%s5054_s11 + $0x58] sm:$0xff] %v2439_v59 }
 0x3c5   : > { %2487 = vst [vmem:[%s5057_s12 + $0x58] sm:$0xff] %v2471_v19 }
 0x3c7   : > { %v2418_v62 = vpop.f32.mrf.mxu2 }
 0x3c8   : > { %v2419_v46 = vadd.f32 %v2418_v62, %v2369_v63 }
 0x3c9   : > { %v2306_v57 = vpop.f32.mrf.mxu0 }
 0x3ca   : > { %v2440_v30 = vsub.f32 %v2305_v55, %v2419_v46  ;;  %v2472_v13 = vadd.f32 %v2419_v46, %v2305_v55  ;;  %v2307_v4 = vadd.f32 %v2306_v57, %v2257_v38 }
 0x3cc   : > { %2456 = vst [vmem:[%s5054_s11 + $0x60] sm:$0xff] %v2440_v30 }
 0x3cd   : > { %2488 = vst [vmem:[%s5057_s12 + $0x60] sm:$0xff] %v2472_v13 }
 0x3cf   : > { %v2420_v40 = vpop.f32.mrf.mxu2 }
 0x3d0   : > { %v2421_v41 = vadd.f32 %v2420_v40, %v2371_v61 }
 0x3d1   : > { %v2309_v3 = vpop.f32.mrf.mxu0 }
 0x3d2   : > { %v2441_v5 = vsub.f32 %v2307_v4, %v2421_v41  ;;  %v2473_v26 = vadd.f32 %v2421_v41, %v2307_v4  ;;  %v2310_v29 = vadd.f32 %v2309_v3, %v2260_v47 }
 0x3d4   : > { %2457 = vst [vmem:[%s5054_s11 + $0x68] sm:$0xff] %v2441_v5 }
 0x3d5   : > { %2489 = vst [vmem:[%s5057_s12 + $0x68] sm:$0xff] %v2473_v26 }
 0x3d7   : > { %v2423_v32 = vpop.f32.mrf.mxu2 }
 0x3d8   : > { %v2424_v51 = vadd.f32 %v2423_v32, %v2374_v2 }
 0x3d9   : > { %v2311_v17 = vpop.f32.mrf.mxu0 }
 0x3da   : > { %v2442_v45 = vsub.f32 %v2310_v29, %v2424_v51  ;;  %v2474_v28 = vadd.f32 %v2424_v51, %v2310_v29  ;;  %v2312_v9 = vadd.f32 %v2311_v17, %v2262_v16 }
 0x3dc   : > { %2458 = vst [vmem:[%s5054_s11 + $0x70] sm:$0xff] %v2442_v45 }
 0x3dd   : > { %2490 = vst [vmem:[%s5057_s12 + $0x70] sm:$0xff] %v2474_v28 }
 0x3df   : > { %v2425_v58 = vpop.f32.mrf.mxu2 }
 0x3e0   : > { %v2426_v53 = vadd.f32 %v2425_v58, %v2376_v8 }
 0x3e2   : > { %v2443_v56 = vsub.f32 %v2312_v9, %v2426_v53  ;;  %v2475_v27 = vadd.f32 %v2426_v53, %v2312_v9 }
 0x3e4   : > { %2459 = vst [vmem:[%s5054_s11 + $0x78] sm:$0xff] %v2443_v56 }
 0x3e5   : > { %2491 = vst [vmem:[%s5057_s12 + $0x78] sm:$0xff] %v2475_v27 }
 0x3e6   : > { %3630 = shalt.err (!%p3627_p5)
}
 0x3e7   : > { %s3715_s11 = smov 128   ;;  %s3716_s12 = smov 8  }
 0x3e8   : > { %3541 = dma.vmem_to_hbm [thread:$0]  (%p3782_p4), %s2512_s18, 2048, %s2514_s29, %s2493_s6, %s3715_s11, %s3715_s11, %s3716_s12  }
 0x3e9   : > { %s2498_s24 = scalar_lea.sflag [#allocation5], %s5051_s9  ;;  %s3645_s26 = sshra.s32 %s5100_s5, 4  ;;  %s3646_s26 = int_to_ptr.hbm [resolvable:$true] %s3645_s26 }
 0x3ea   : > { %s3647_s7 = scalar_lea.hbm %s3646_s26, 128  ;;  %s3651_s13 = scalar_lea.hbm %s5154_s4, 256 }
 0x3eb   : > { %p3648_p6 = scmp.ne.s32.totalorder %s3646_s26, %s3647_s7  ;;  %p3652_p10 = scmp.lt.s32.totalorder %s3646_s26, %s5154_s4 }
 0x3ec   : > { %p3653_p11 = scmp.lt.s32.totalorder %s3651_s13, %s3647_s7 }
 0x3ed   : > { %p3649_p7 = pnand %p3648_p6, %p3782_p4 }
 0x3ee   : > { %p3654_p12 = por %p3653_p11, %p3652_p10 }
 0x3ef   : > { %p3650_p9 = pneg %p3649_p7 }
 0x3f1   : > { %p3655_p13 = pnand %p3654_p12, %p3650_p9 }
 0x3f3   : > { %3658 = shalt.err (!%p3655_p13)
}
 0x3f4   : > { %3542 = dma.vmem_to_hbm [thread:$0]  (%p3782_p4), %s5098_s30, 2048, %s5100_s5, %s2498_s24, %s3715_s11, %s3715_s11, %s3716_s12  }
 0x3f5 PF: > { %p3552_p0 = scmp.ge.s32.totalorder %s3713_s20, 2  ;;  %s2546_s9 = sand.u32 1, %s3693_s15  }
 0x3f6   : > { %s2547_s18 = scalar_lea.sflag [#allocation3], %s2546_s9 }
 0x3f7   : > { %p3546_p1 = pnand %p3552_p0, %p3789_p8 }
 0x3f9   : > { %p3547_p2 = pneg %p3546_p1 }
 0x3fb   : > { %3684 = dma.done.wait (%p3547_p2), %s2547_s18, 2048  }
 0x3fc   : > { %3686 = vsyncadd (%p3547_p2), %s2547_s18, 4294965248  ;;  %s2557_s29 = scalar_lea.sflag [#allocation5], %s2546_s9 }
 0x3fd   : > { %3688 = dma.done.wait (%p3547_p2), %s2557_s29, 2048  }
 0x3fe   : > { %3690 = vsyncadd (%p3547_p2), %s2557_s29, 4294965248  ;;  %s21_s20 = sadd.s32 1, %s3713_s20   ;;  %s5175_s15 = smov %s3697_s16 }
 0x3ff   : > { %p18_p3 = scmp.ge.s32.totalorder %s21_s20, 4   ;;  %s5176_s16 = smov %s3701_s17 }
 0x400   : > { %s5177_s17 = smov %s3795_s28  ;;  %s5178_s18 = smov %s3709_s19 }
 0x401   : > { %s5179_s19 = smov %s5181_s23  ;;  %20 = sbr.rel (!%p18_p3) target bundleno = 6 (0x6), region = 84 }
 0x406   :  { %2563 = vsyncpa [#allocation3], 1 }
 0x407   :  { %2565 = vsyncpa [#allocation3 + $0x1], 1 }
 0x408   :  { %2566 = vsyncpa [#allocation5], 1 }
 0x409   :  { %2568 = vsyncpa [#allocation5 + $0x1], 1 }

</bundles_post_ra>
